<compile_context>
chip_gen: v7x
topology: tpu7x:2x2x1
jax: 0.10.0
libtpu: 0.0.40
codegen_flags: <defaults>
</compile_context>

<pallas_src>
import functools

import jax
import jax.numpy as jnp
from jax.experimental import pallas as pl
from jax.experimental.pallas import tpu as pltpu


def _round_up(x, m):
    return ((x + m - 1) // m) * m


# ----------------------------------------------------------------------------
# Kernel
# ----------------------------------------------------------------------------
def _lcc_kernel(i_ref, j_ref, out_ref, *, H, W, real_lanes, pad, win_size, eps):
    """One batch chunk: i_ref/j_ref blocks are (1, Hp, Gc), zero padded."""
    Iv = i_ref[0]                       # (Hp, Gc) float32
    Jv = j_ref[0]
    Hp, Gc = Iv.shape
    n_lanes = 5 * Gc

    # Fused 5-channel slab: [I | J | I*I | J*J | I*J] along lanes.
    X = jnp.concatenate([Iv, Jv, Iv * Iv, Jv * Jv, Iv * Jv], axis=1)

    # Index helpers for the roll masks (cheap iota + compare; no (5G)^2
    # filter matrices and nothing DMA'd for them).
    row = jax.lax.broadcasted_iota(jnp.int32, (Hp, n_lanes), 0)
    seg_col = jax.lax.broadcasted_iota(jnp.int32, (Hp, Gc), 1)
    col_in_img = jnp.concatenate([seg_col % W] * 5, axis=1)   # lane pos within image

    # --- row (sublane) boxsum: zero rows beyond H make masking-by-Hp exact ---
    T = X
    for d in range(1, pad + 1):
        up = pltpu.roll(X, Hp - d, axis=0)       # up[r]  = X[(r + d) mod Hp]
        dn = pltpu.roll(X, d, axis=0)            # dn[r]  = X[(r - d) mod Hp]
        T = T + jnp.where(row < Hp - d, up, 0.0) + jnp.where(row >= d, dn, 0.0)

    # --- column (lane) boxsum, per W-wide image block (masks stop any
    #     cross-image / cross-channel / wrap-around leakage) ---
    R = T
    for d in range(1, pad + 1):
        rt = pltpu.roll(T, n_lanes - d, axis=1)  # rt[:,c] = T[:, (c + d) mod n]
        lf = pltpu.roll(T, d, axis=1)            # lf[:,c] = T[:, (c - d) mod n]
        R = (R + jnp.where(col_in_img < W - d, rt, 0.0)
               + jnp.where(col_in_img >= d, lf, 0.0))

    # Channel slices are 128-lane aligned because Gc is a multiple of 128.
    I_sum = R[:, 0 * Gc:1 * Gc]
    J_sum = R[:, 1 * Gc:2 * Gc]
    I2_sum = R[:, 2 * Gc:3 * Gc]
    J2_sum = R[:, 3 * Gc:4 * Gc]
    IJ_sum = R[:, 4 * Gc:5 * Gc]

    # Algebraically simplified epilogue (identical math, ~half the VPU ops).
    inv_ws = 1.0 / win_size
    cross = IJ_sum - I_sum * J_sum * inv_ws
    I_var = I2_sum - I_sum * I_sum * inv_ws
    J_var = J2_sum - J_sum * J_sum * inv_ws
    cc = cross * cross / (I_var * J_var + eps)

    # Discard zero-padded rows / lanes (they must not enter the mean).
    seg_row = jax.lax.broadcasted_iota(jnp.int32, (Hp, Gc), 0)
    valid = (seg_row < H) & (seg_col < real_lanes)
    cc = jnp.where(valid, cc, 0.0)

    # Per-chunk partial sum as a full lane-dense vreg block (unmasked store);
    # the wrapper reads element [0, 0] of each chunk's block and sums.
    out_ref[...] = jnp.broadcast_to(jnp.sum(cc), (1, 8, 128))


# ----------------------------------------------------------------------------
# Sizing / hardware-aware chunk selection
# ----------------------------------------------------------------------------
def _vmem_capacity_bytes():
    try:
        info = pltpu.get_tpu_info()
        cap = getattr(info, "vmem_capacity_bytes", None)
        if cap:
            return int(cap)
    except Exception:
        pass
    return 64 * 2**20          # conservative default (v7x has 64 MiB / TC)


def _num_tensorcores():
    try:
        info = pltpu.get_tpu_info()
        for name in ("num_cores", "core_count", "num_tensorcores", "tensorcore_count"):
            v = getattr(info, name, None)
            if isinstance(v, int) and v > 0:
                return v
    except Exception:
        pass
    try:
        v = getattr(jax.devices()[0], "num_cores", None)
        if isinstance(v, int) and v > 0:
            return v
    except Exception:
        pass
    return 1


def _chunk_vmem_bytes(Bt, H, W):
    """Generous per-chunk VMEM estimate for the roll-based kernel."""
    Hp = _round_up(max(H, 1), 8)
    Gc = _round_up(Bt * W, 128)
    slab = Hp * 5 * Gc * 4                 # one fused 5-channel f32 slab
    inputs = 2 * 2 * Hp * Gc * 4           # 2 inputs x 2 pipeline buffers
    work = 4 * slab                        # X, boxsum accumulators, roll temps
    masks = 2 * slab                       # int32 row iota + lane-position iota
    return inputs + work + masks + 2 * 8 * 128 * 4


def _pick_batch_chunk(B, H, W, budget_bytes, num_cores):
    divisors = [bt for bt in range(1, B + 1) if B % bt == 0]
    fitting = [bt for bt in divisors if _chunk_vmem_bytes(bt, H, W) <= budget_bytes]
    if not fitting:
        fitting = [1]                      # smallest chunk; vmem_limit raised below
    if num_cores >= 2:
        # Prefer a grid with a core-multiple number of steps so the "parallel"
        # axis actually feeds every TensorCore (e.g. v7x has 2 per chip).
        multi = [bt for bt in fitting if (B // bt) % num_cores == 0]
        if multi:
            return max(multi)
    return max(fitting)


# ----------------------------------------------------------------------------
# Wrapper
# ----------------------------------------------------------------------------
def lcc_loss(I, J, win=(9, 9), eps=1e-5):
    """I, J: (B, 1, H, W) arrays. Returns scalar -mean(cc) + 1 (float32)."""
    B, C, H, W = I.shape
    assert C == 1, "LCC conv filter has a single input channel"
    assert win[0] == win[1], "square windows only (matches the default win=[9,9])"
    pad = win[0] // 2
    win_size = float(win[0] * win[1])

    cap = _vmem_capacity_bytes()
    num_cores = _num_tensorcores()
    budget = (7 * cap) // 10                             # ~70% of physical VMEM
    Bt = _pick_batch_chunk(B, H, W, budget, num_cores)
    num_steps = B // Bt

    Hp = _round_up(H, 8)
    Gc = _round_up(Bt * W, 128)

    def to_slab(a):
        # (B, H, W) -> (num_steps, Hp, Gc); image b of a chunk occupies lanes
        # [b*W, (b+1)*W); padded rows/lanes are zero (contribute 0 to the loss).
        a = a.reshape(num_steps, Bt, H, W).transpose(0, 2, 1, 3)
        a = a.reshape(num_steps, H, Bt * W)
        return jnp.pad(a, ((0, 0), (0, Hp - H), (0, Gc - Bt * W)))

    I_s = to_slab(I[:, 0].astype(jnp.float32))
    J_s = to_slab(J[:, 0].astype(jnp.float32))

    # VMEM limit: at least the scoped default, never below the computed need,
    # never above (capacity - headroom).
    need = _chunk_vmem_bytes(Bt, H, W)
    vmem_limit = int(max(32 * 2**20, min(cap - 2 * 2**20, need + need // 4)))

    kernel = functools.partial(_lcc_kernel, H=H, W=W, real_lanes=Bt * W,
                               pad=pad, win_size=win_size, eps=float(eps))

    partials = pl.pallas_call(
        kernel,
        out_shape=jax.ShapeDtypeStruct((num_steps, 8, 128), jnp.float32),
        grid_spec=pltpu.PrefetchScalarGridSpec(
            num_scalar_prefetch=0,
            grid=(num_steps,),
            in_specs=[
                pl.BlockSpec((1, Hp, Gc), lambda g: (g, 0, 0)),   # I chunk
                pl.BlockSpec((1, Hp, Gc), lambda g: (g, 0, 0)),   # J chunk
            ],
            out_specs=pl.BlockSpec((1, 8, 128), lambda g: (g, 0, 0)),
        ),
        compiler_params=pltpu.CompilerParams(
            dimension_semantics=("parallel",),
            vmem_limit_bytes=vmem_limit,
        ),
    )(I_s, J_s)

    total = jnp.sum(partials[:, 0, 0])
    mean_cc = total / float(B * H * W)
    return -mean_cc + 1.0


# ----------------------------------------------------------------------------
# Pure-JAX reference (float32, lax conv box filter) for self-check
# ----------------------------------------------------------------------------
def _lcc_ref(I, J, win=(9, 9), eps=1e-5):
    pad = win[0] // 2
    f = jnp.ones((1, 1, win[0], win[1]), jnp.float32)

    def conv(x):
        return jax.lax.conv_general_dilated(
            x, f, window_strides=(1, 1), padding=[(pad, pad), (pad, pad)],
            dimension_numbers=("NCHW", "OIHW", "NCHW"))

    I = I.astype(jnp.float32)
    J = J.astype(jnp.float32)
    ws = float(win[0] * win[1])
    I_sum, J_sum = conv(I), conv(J)
    I2_sum, J2_sum, IJ_sum = conv(I * I), conv(J * J), conv(I * J)
    u_I, u_J = I_sum / ws, J_sum / ws
    cross = IJ_sum - u_J * I_sum - u_I * J_sum + u_I * u_J * ws
    I_var = I2_sum - 2.0 * u_I * I_sum + u_I * u_I * ws
    J_var = J2_sum - 2.0 * u_J * J_sum + u_J * u_J * ws
    cc = cross * cross / (I_var * J_var + eps)
    return -jnp.mean(cc) + 1.0


if __name__ == "__main__":
    key = jax.random.PRNGKey(0)
    k1, k2 = jax.random.split(key)
    B, C, H, W = 2, 1, 16, 16
    I = jax.random.uniform(k1, (B, C, H, W), dtype=jnp.float32)
    J = jax.random.uniform(k2, (B, C, H, W), dtype=jnp.float32)

    loss = lcc_loss(I, J)
    jax.block_until_ready(loss)

    ref = _lcc_ref(I, J)
    assert jnp.allclose(loss, ref, rtol=2e-3, atol=2e-3), (float(loss), float(ref))

    print("KERNEL_OK")
</pallas_src>

<mosaic_0001>
module attributes {stable_mosaic.version = 11 : i64} {
  func.func @_lcc_kernel(%arg0: i32, %arg1: memref<1x16x128xf32, #tpu.memory_space<vmem>>, %arg2: memref<1x16x128xf32, #tpu.memory_space<vmem>>, %arg3: memref<1x8x128xf32, #tpu.memory_space<vmem>>) attributes {dimension_semantics = [#tpu.dimension_semantics<parallel>], iteration_bounds = array<i64: 1>, scalar_prefetch = 0 : i64, scratch_operands = 0 : i64, tpu.core_type = #tpu.core_type<tc>, window_params = [{transform_indices = @transform_0, window_bounds = array<i64: 1, 16, 128>}, {transform_indices = @transform_1, window_bounds = array<i64: 1, 16, 128>}, {transform_indices = @transform_2, window_bounds = array<i64: 1, 8, 128>}]} {
    %c0 = arith.constant 0 : index
    %c0_0 = arith.constant 0 : index
    %c0_1 = arith.constant 0 : index
    %0 = vector.load %arg1[%c0, %c0_0, %c0_1] : memref<1x16x128xf32, #tpu.memory_space<vmem>>, vector<1x16x128xf32>
    %1 = vector.shape_cast %0 : vector<1x16x128xf32> to vector<16x128xf32>
    %c0_2 = arith.constant 0 : index
    %c0_3 = arith.constant 0 : index
    %c0_4 = arith.constant 0 : index
    %2 = vector.load %arg2[%c0_2, %c0_3, %c0_4] : memref<1x16x128xf32, #tpu.memory_space<vmem>>, vector<1x16x128xf32>
    %3 = vector.shape_cast %2 : vector<1x16x128xf32> to vector<16x128xf32>
    %4 = arith.mulf %1, %1 : vector<16x128xf32>
    %5 = arith.mulf %3, %3 : vector<16x128xf32>
    %6 = arith.mulf %1, %3 : vector<16x128xf32>
    %7 = tpu.concatenate %1, %3, %4, %5, %6 in 1 : vector<16x128xf32>, vector<16x128xf32>, vector<16x128xf32>, vector<16x128xf32>, vector<16x128xf32> -> vector<16x640xf32>
    %8 = tpu.iota {dimensions = array<i32: 0>} : vector<16x640xi32>
    %9 = tpu.iota {dimensions = array<i32: 1>} : vector<16x128xi32>
    %c16_i32 = arith.constant 16 : i32
    %c0_i32 = arith.constant 0 : i32
    %10 = arith.cmpi eq, %c16_i32, %c0_i32 : i32
    %c1_i32 = arith.constant 1 : i32
    %11 = arith.select %10, %c1_i32, %c16_i32 : i32
    %12 = vector.broadcast %11 : i32 to vector<16x128xi32>
    %13 = arith.remsi %9, %12 : vector<16x128xi32>
    %c0_i32_5 = arith.constant 0 : i32
    %14 = vector.broadcast %c0_i32_5 : i32 to vector<16x128xi32>
    %15 = arith.cmpi ne, %13, %14 : vector<16x128xi32>
    %c0_i32_6 = arith.constant 0 : i32
    %16 = vector.broadcast %c0_i32_6 : i32 to vector<16x128xi32>
    %17 = arith.cmpi slt, %13, %16 : vector<16x128xi32>
    %c0_i32_7 = arith.constant 0 : i32
    %18 = arith.cmpi slt, %11, %c0_i32_7 : i32
    %19 = vector.broadcast %18 : i1 to vector<16x128xi1>
    %20 = vector.broadcast %19 : vector<16x128xi1> to vector<16x128xi1>
    %21 = arith.xori %17, %20 : vector<16x128xi1>
    %22 = arith.andi %21, %15 : vector<16x128xi1>
    %23 = vector.broadcast %11 : i32 to vector<16x128xi32>
    %24 = arith.addi %13, %23 : vector<16x128xi32>
    %25 = arith.select %22, %24, %13 : vector<16x128xi1>, vector<16x128xi32>
    %26 = tpu.concatenate %25, %25, %25, %25, %25 in 1 : vector<16x128xi32>, vector<16x128xi32>, vector<16x128xi32>, vector<16x128xi32>, vector<16x128xi32> -> vector<16x640xi32>
    %c15_i32 = arith.constant 15 : i32
    %27 = tpu.dynamic_rotate %7 by %c15_i32 dim 0 : vector<16x640xf32>, i32 -> vector<16x640xf32>
    %c1_i32_8 = arith.constant 1 : i32
    %28 = tpu.dynamic_rotate %7 by %c1_i32_8 dim 0 : vector<16x640xf32>, i32 -> vector<16x640xf32>
    %c15_i32_9 = arith.constant 15 : i32
    %29 = vector.broadcast %c15_i32_9 : i32 to vector<16x640xi32>
    %30 = arith.cmpi slt, %8, %29 : vector<16x640xi32>
    %cst = arith.constant 0.000000e+00 : f32
    %31 = vector.broadcast %cst : f32 to vector<16x640xf32>
    %32 = arith.select %30, %27, %31 : vector<16x640xi1>, vector<16x640xf32>
    %33 = arith.addf %7, %32 : vector<16x640xf32>
    %c1_i32_10 = arith.constant 1 : i32
    %34 = vector.broadcast %c1_i32_10 : i32 to vector<16x640xi32>
    %35 = arith.cmpi sge, %8, %34 : vector<16x640xi32>
    %cst_11 = arith.constant 0.000000e+00 : f32
    %36 = vector.broadcast %cst_11 : f32 to vector<16x640xf32>
    %37 = arith.select %35, %28, %36 : vector<16x640xi1>, vector<16x640xf32>
    %38 = arith.addf %33, %37 : vector<16x640xf32>
    %c14_i32 = arith.constant 14 : i32
    %39 = tpu.dynamic_rotate %7 by %c14_i32 dim 0 : vector<16x640xf32>, i32 -> vector<16x640xf32>
    %c2_i32 = arith.constant 2 : i32
    %40 = tpu.dynamic_rotate %7 by %c2_i32 dim 0 : vector<16x640xf32>, i32 -> vector<16x640xf32>
    %c14_i32_12 = arith.constant 14 : i32
    %41 = vector.broadcast %c14_i32_12 : i32 to vector<16x640xi32>
    %42 = arith.cmpi slt, %8, %41 : vector<16x640xi32>
    %cst_13 = arith.constant 0.000000e+00 : f32
    %43 = vector.broadcast %cst_13 : f32 to vector<16x640xf32>
    %44 = arith.select %42, %39, %43 : vector<16x640xi1>, vector<16x640xf32>
    %45 = arith.addf %38, %44 : vector<16x640xf32>
    %c2_i32_14 = arith.constant 2 : i32
    %46 = vector.broadcast %c2_i32_14 : i32 to vector<16x640xi32>
    %47 = arith.cmpi sge, %8, %46 : vector<16x640xi32>
    %cst_15 = arith.constant 0.000000e+00 : f32
    %48 = vector.broadcast %cst_15 : f32 to vector<16x640xf32>
    %49 = arith.select %47, %40, %48 : vector<16x640xi1>, vector<16x640xf32>
    %50 = arith.addf %45, %49 : vector<16x640xf32>
    %c13_i32 = arith.constant 13 : i32
    %51 = tpu.dynamic_rotate %7 by %c13_i32 dim 0 : vector<16x640xf32>, i32 -> vector<16x640xf32>
    %c3_i32 = arith.constant 3 : i32
    %52 = tpu.dynamic_rotate %7 by %c3_i32 dim 0 : vector<16x640xf32>, i32 -> vector<16x640xf32>
    %c13_i32_16 = arith.constant 13 : i32
    %53 = vector.broadcast %c13_i32_16 : i32 to vector<16x640xi32>
    %54 = arith.cmpi slt, %8, %53 : vector<16x640xi32>
    %cst_17 = arith.constant 0.000000e+00 : f32
    %55 = vector.broadcast %cst_17 : f32 to vector<16x640xf32>
    %56 = arith.select %54, %51, %55 : vector<16x640xi1>, vector<16x640xf32>
    %57 = arith.addf %50, %56 : vector<16x640xf32>
    %c3_i32_18 = arith.constant 3 : i32
    %58 = vector.broadcast %c3_i32_18 : i32 to vector<16x640xi32>
    %59 = arith.cmpi sge, %8, %58 : vector<16x640xi32>
    %cst_19 = arith.constant 0.000000e+00 : f32
    %60 = vector.broadcast %cst_19 : f32 to vector<16x640xf32>
    %61 = arith.select %59, %52, %60 : vector<16x640xi1>, vector<16x640xf32>
    %62 = arith.addf %57, %61 : vector<16x640xf32>
    %c12_i32 = arith.constant 12 : i32
    %63 = tpu.dynamic_rotate %7 by %c12_i32 dim 0 : vector<16x640xf32>, i32 -> vector<16x640xf32>
    %c4_i32 = arith.constant 4 : i32
    %64 = tpu.dynamic_rotate %7 by %c4_i32 dim 0 : vector<16x640xf32>, i32 -> vector<16x640xf32>
    %c12_i32_20 = arith.constant 12 : i32
    %65 = vector.broadcast %c12_i32_20 : i32 to vector<16x640xi32>
    %66 = arith.cmpi slt, %8, %65 : vector<16x640xi32>
    %cst_21 = arith.constant 0.000000e+00 : f32
    %67 = vector.broadcast %cst_21 : f32 to vector<16x640xf32>
    %68 = arith.select %66, %63, %67 : vector<16x640xi1>, vector<16x640xf32>
    %69 = arith.addf %62, %68 : vector<16x640xf32>
    %c4_i32_22 = arith.constant 4 : i32
    %70 = vector.broadcast %c4_i32_22 : i32 to vector<16x640xi32>
    %71 = arith.cmpi sge, %8, %70 : vector<16x640xi32>
    %cst_23 = arith.constant 0.000000e+00 : f32
    %72 = vector.broadcast %cst_23 : f32 to vector<16x640xf32>
    %73 = arith.select %71, %64, %72 : vector<16x640xi1>, vector<16x640xf32>
    %74 = arith.addf %69, %73 : vector<16x640xf32>
    %c639_i32 = arith.constant 639 : i32
    %75 = tpu.dynamic_rotate %74 by %c639_i32 dim 1 : vector<16x640xf32>, i32 -> vector<16x640xf32>
    %c1_i32_24 = arith.constant 1 : i32
    %76 = tpu.dynamic_rotate %74 by %c1_i32_24 dim 1 : vector<16x640xf32>, i32 -> vector<16x640xf32>
    %c15_i32_25 = arith.constant 15 : i32
    %77 = vector.broadcast %c15_i32_25 : i32 to vector<16x640xi32>
    %78 = arith.cmpi slt, %26, %77 : vector<16x640xi32>
    %cst_26 = arith.constant 0.000000e+00 : f32
    %79 = vector.broadcast %cst_26 : f32 to vector<16x640xf32>
    %80 = arith.select %78, %75, %79 : vector<16x640xi1>, vector<16x640xf32>
    %81 = arith.addf %74, %80 : vector<16x640xf32>
    %c1_i32_27 = arith.constant 1 : i32
    %82 = vector.broadcast %c1_i32_27 : i32 to vector<16x640xi32>
    %83 = arith.cmpi sge, %26, %82 : vector<16x640xi32>
    %cst_28 = arith.constant 0.000000e+00 : f32
    %84 = vector.broadcast %cst_28 : f32 to vector<16x640xf32>
    %85 = arith.select %83, %76, %84 : vector<16x640xi1>, vector<16x640xf32>
    %86 = arith.addf %81, %85 : vector<16x640xf32>
    %c638_i32 = arith.constant 638 : i32
    %87 = tpu.dynamic_rotate %74 by %c638_i32 dim 1 : vector<16x640xf32>, i32 -> vector<16x640xf32>
    %c2_i32_29 = arith.constant 2 : i32
    %88 = tpu.dynamic_rotate %74 by %c2_i32_29 dim 1 : vector<16x640xf32>, i32 -> vector<16x640xf32>
    %c14_i32_30 = arith.constant 14 : i32
    %89 = vector.broadcast %c14_i32_30 : i32 to vector<16x640xi32>
    %90 = arith.cmpi slt, %26, %89 : vector<16x640xi32>
    %cst_31 = arith.constant 0.000000e+00 : f32
    %91 = vector.broadcast %cst_31 : f32 to vector<16x640xf32>
    %92 = arith.select %90, %87, %91 : vector<16x640xi1>, vector<16x640xf32>
    %93 = arith.addf %86, %92 : vector<16x640xf32>
    %c2_i32_32 = arith.constant 2 : i32
    %94 = vector.broadcast %c2_i32_32 : i32 to vector<16x640xi32>
    %95 = arith.cmpi sge, %26, %94 : vector<16x640xi32>
    %cst_33 = arith.constant 0.000000e+00 : f32
    %96 = vector.broadcast %cst_33 : f32 to vector<16x640xf32>
    %97 = arith.select %95, %88, %96 : vector<16x640xi1>, vector<16x640xf32>
    %98 = arith.addf %93, %97 : vector<16x640xf32>
    %c637_i32 = arith.constant 637 : i32
    %99 = tpu.dynamic_rotate %74 by %c637_i32 dim 1 : vector<16x640xf32>, i32 -> vector<16x640xf32>
    %c3_i32_34 = arith.constant 3 : i32
    %100 = tpu.dynamic_rotate %74 by %c3_i32_34 dim 1 : vector<16x640xf32>, i32 -> vector<16x640xf32>
    %c13_i32_35 = arith.constant 13 : i32
    %101 = vector.broadcast %c13_i32_35 : i32 to vector<16x640xi32>
    %102 = arith.cmpi slt, %26, %101 : vector<16x640xi32>
    %cst_36 = arith.constant 0.000000e+00 : f32
    %103 = vector.broadcast %cst_36 : f32 to vector<16x640xf32>
    %104 = arith.select %102, %99, %103 : vector<16x640xi1>, vector<16x640xf32>
    %105 = arith.addf %98, %104 : vector<16x640xf32>
    %c3_i32_37 = arith.constant 3 : i32
    %106 = vector.broadcast %c3_i32_37 : i32 to vector<16x640xi32>
    %107 = arith.cmpi sge, %26, %106 : vector<16x640xi32>
    %cst_38 = arith.constant 0.000000e+00 : f32
    %108 = vector.broadcast %cst_38 : f32 to vector<16x640xf32>
    %109 = arith.select %107, %100, %108 : vector<16x640xi1>, vector<16x640xf32>
    %110 = arith.addf %105, %109 : vector<16x640xf32>
    %c636_i32 = arith.constant 636 : i32
    %111 = tpu.dynamic_rotate %74 by %c636_i32 dim 1 : vector<16x640xf32>, i32 -> vector<16x640xf32>
    %c4_i32_39 = arith.constant 4 : i32
    %112 = tpu.dynamic_rotate %74 by %c4_i32_39 dim 1 : vector<16x640xf32>, i32 -> vector<16x640xf32>
    %c12_i32_40 = arith.constant 12 : i32
    %113 = vector.broadcast %c12_i32_40 : i32 to vector<16x640xi32>
    %114 = arith.cmpi slt, %26, %113 : vector<16x640xi32>
    %cst_41 = arith.constant 0.000000e+00 : f32
    %115 = vector.broadcast %cst_41 : f32 to vector<16x640xf32>
    %116 = arith.select %114, %111, %115 : vector<16x640xi1>, vector<16x640xf32>
    %117 = arith.addf %110, %116 : vector<16x640xf32>
    %c4_i32_42 = arith.constant 4 : i32
    %118 = vector.broadcast %c4_i32_42 : i32 to vector<16x640xi32>
    %119 = arith.cmpi sge, %26, %118 : vector<16x640xi32>
    %cst_43 = arith.constant 0.000000e+00 : f32
    %120 = vector.broadcast %cst_43 : f32 to vector<16x640xf32>
    %121 = arith.select %119, %112, %120 : vector<16x640xi1>, vector<16x640xf32>
    %122 = arith.addf %117, %121 : vector<16x640xf32>
    %123 = vector.extract_strided_slice %122 {offsets = [0, 0], sizes = [16, 128], strides = [1, 1]} : vector<16x640xf32> to vector<16x128xf32>
    %124 = vector.extract_strided_slice %122 {offsets = [0, 128], sizes = [16, 128], strides = [1, 1]} : vector<16x640xf32> to vector<16x128xf32>
    %125 = vector.extract_strided_slice %122 {offsets = [0, 256], sizes = [16, 128], strides = [1, 1]} : vector<16x640xf32> to vector<16x128xf32>
    %126 = vector.extract_strided_slice %122 {offsets = [0, 384], sizes = [16, 128], strides = [1, 1]} : vector<16x640xf32> to vector<16x128xf32>
    %127 = vector.extract_strided_slice %122 {offsets = [0, 512], sizes = [16, 128], strides = [1, 1]} : vector<16x640xf32> to vector<16x128xf32>
    %128 = arith.mulf %123, %124 : vector<16x128xf32>
    %cst_44 = arith.constant 0.0123456791 : f32
    %129 = vector.broadcast %cst_44 : f32 to vector<16x128xf32>
    %130 = arith.mulf %128, %129 : vector<16x128xf32>
    %131 = arith.subf %127, %130 : vector<16x128xf32>
    %132 = arith.mulf %123, %123 : vector<16x128xf32>
    %cst_45 = arith.constant 0.0123456791 : f32
    %133 = vector.broadcast %cst_45 : f32 to vector<16x128xf32>
    %134 = arith.mulf %132, %133 : vector<16x128xf32>
    %135 = arith.subf %125, %134 : vector<16x128xf32>
    %136 = arith.mulf %124, %124 : vector<16x128xf32>
    %cst_46 = arith.constant 0.0123456791 : f32
    %137 = vector.broadcast %cst_46 : f32 to vector<16x128xf32>
    %138 = arith.mulf %136, %137 : vector<16x128xf32>
    %139 = arith.subf %126, %138 : vector<16x128xf32>
    %140 = arith.mulf %131, %131 : vector<16x128xf32>
    %141 = arith.mulf %135, %139 : vector<16x128xf32>
    %cst_47 = arith.constant 9.99999974E-6 : f32
    %142 = vector.broadcast %cst_47 : f32 to vector<16x128xf32>
    %143 = arith.addf %141, %142 : vector<16x128xf32>
    %144 = arith.divf %140, %143 : vector<16x128xf32>
    %145 = tpu.iota {dimensions = array<i32: 0>} : vector<16x128xi32>
    %c16_i32_48 = arith.constant 16 : i32
    %146 = vector.broadcast %c16_i32_48 : i32 to vector<16x128xi32>
    %147 = arith.cmpi slt, %145, %146 : vector<16x128xi32>
    %c32_i32 = arith.constant 32 : i32
    %148 = vector.broadcast %c32_i32 : i32 to vector<16x128xi32>
    %149 = arith.cmpi slt, %9, %148 : vector<16x128xi32>
    %150 = arith.andi %147, %149 : vector<16x128xi1>
    %cst_49 = arith.constant 0.000000e+00 : f32
    %151 = vector.broadcast %cst_49 : f32 to vector<16x128xf32>
    %152 = arith.select %150, %144, %151 : vector<16x128xi1>, vector<16x128xf32>
    %153 = vector.shape_cast %152 : vector<16x128xf32> to vector<1x16x128xf32>
    %cst_50 = arith.constant dense<0.000000e+00> : vector<1xf32>
    %154 = vector.multi_reduction <add>, %153, %cst_50 [1, 2] : vector<1x16x128xf32> to vector<1xf32>
    %155 = vector.shape_cast %154 : vector<1xf32> to vector<1x1x1xf32>
    %156 = vector.extract %155[0, 0, 0] : f32 from vector<1x1x1xf32>
    %157 = vector.broadcast %156 : f32 to vector<1x8x128xf32>
    %c0_51 = arith.constant 0 : index
    %c0_52 = arith.constant 0 : index
    %c0_53 = arith.constant 0 : index
    %158 = vector.load %arg3[%c0_51, %c0_52, %c0_53] : memref<1x8x128xf32, #tpu.memory_space<vmem>>, vector<1x8x128xf32>
    tpu.vector_store %arg3[%c0_51, %c0_52, %c0_53], %157 {strides = array<i32>} : memref<1x8x128xf32, #tpu.memory_space<vmem>>, vector<1x8x128xf32>,
    return
  }
  func.func @transform_0(%arg0: i32) -> (i32, i32, i32) {
    %c0_i32 = arith.constant 0 : i32
    %c0_i32_0 = arith.constant 0 : i32
    %c0_i32_1 = arith.constant 0 : i32
    return %arg0, %c0_i32, %c0_i32_0 : i32, i32, i32
  }
  func.func @transform_1(%arg0: i32) -> (i32, i32, i32) {
    %c0_i32 = arith.constant 0 : i32
    %c0_i32_0 = arith.constant 0 : i32
    %c0_i32_1 = arith.constant 0 : i32
    return %arg0, %c0_i32, %c0_i32_0 : i32, i32, i32
  }
  func.func @transform_2(%arg0: i32) -> (i32, i32, i32) {
    %c0_i32 = arith.constant 0 : i32
    %c0_i32_0 = arith.constant 0 : i32
    %c0_i32_1 = arith.constant 0 : i32
    return %arg0, %c0_i32, %c0_i32_0 : i32, i32, i32
  }
}

</mosaic_0001>

<bundles_post_ra>
// kernel: tpu_custom_call.1
= control target key start
LH: loop header
LB: loop body
LE: loop exit
PB: predicated region body
PF: predicated region fallthrough
CT: control target
= control target key end

     0   :  { %7 = vsyncpa [#allocation3], 0  ;;  %s2034_s0 = inlined_call_operand.hbm [shape: f32[1,16,128], index: 0, kind: input, shape index: {}]   ;;  %s2035_s1 = inlined_call_operand.hbm [shape: f32[1,16,128], index: 1, kind: input, shape index: {}]   ;;  %s2036_s2 = inlined_call_operand.hbm [shape: f32[1,8,128], index: 2, kind: output, shape index: {}]  }
   0x1   :  { %8 = vsyncpa [#allocation6], 0 }
   0x2   :  { %9 = vsyncpa [#allocation4], 0  ;;  %s960_s9 = smov [#allocation2]   ;;  %s888_s13 = scalar_lea.hbm %s2034_s0, 256 }
   0x3   :  { %s15_s10 = sshll.u32 %s960_s9, 4  ;;  %p889_p0 = scmp.ne.s32.totalorder %s2034_s0, %s888_s13  ;;  %s16_s10 = int_to_ptr.vmem [resolvable:$true] %s15_s10 }
   0x4   :  { %p892_p1 = scmp.lt.u32.totalorder %s888_s13, %s2034_s0 }
   0x6   :  { %p894_p2 = pnand %p892_p1, %p889_p0 }
   0x8   :  { %897 = shalt.err (!%p894_p2)
}
   0x9   :  { %s898_s18 = scalar_lea.vmem %s16_s10, 256  ;;  %p903_p4 = scmp.lt.s32.totalorder %s16_s10, %s16_s10 }
   0xa   :  { %p899_p3 = scmp.ne.s32.totalorder %s16_s10, %s898_s18  ;;  %p904_p5 = scmp.lt.s32.totalorder %s898_s18, %s898_s18 }
   0xc   :  { %p905_p6 = por %p904_p5, %p903_p4 }
   0xe   :  { %p906_p7 = pnand %p905_p6, %p899_p3 }
  0x10   :  { %909 = shalt.err (!%p906_p7)
}
  0x11   :  { %s961_s19 = smov 128   ;;  %s962_s20 = smov 8  }
  0x12   :  { %21 = dma.hbm_to_vmem [thread:$0]  %s2034_s0, 256, %s16_s10, [#allocation3], %s961_s19, %s961_s19, %s962_s20  }
  0x13   :  { %s963_s23 = smov [#allocation5]   ;;  %s910_s27 = scalar_lea.hbm %s2035_s1, 256 }
  0x14   :  { %s27_s24 = sshll.u32 %s963_s23, 4  ;;  %p911_p8 = scmp.ne.s32.totalorder %s2035_s1, %s910_s27  ;;  %s28_s24 = int_to_ptr.vmem [resolvable:$true] %s27_s24 }
  0x15   :  { %p914_p9 = scmp.lt.u32.totalorder %s910_s27, %s2035_s1 }
  0x17   :  { %p916_p10 = pnand %p914_p9, %p911_p8 }
  0x19   :  { %919 = shalt.err (!%p916_p10)
}
  0x1a   :  { %s920_s4 = scalar_lea.vmem %s28_s24, 256  ;;  %p925_p12 = scmp.lt.s32.totalorder %s28_s24, %s28_s24 }
  0x1b   :  { %p921_p11 = scmp.ne.s32.totalorder %s28_s24, %s920_s4  ;;  %p926_p13 = scmp.lt.s32.totalorder %s920_s4, %s920_s4 }
  0x1d   :  { %p927_p0 = por %p926_p13, %p925_p12 }
  0x1f   :  { %p928_p1 = pnand %p927_p0, %p921_p11 }
  0x21   :  { %931 = shalt.err (!%p928_p1)
}
  0x22   :  { %33 = dma.hbm_to_vmem [thread:$0]  %s2035_s1, 256, %s28_s24, [#allocation6], %s961_s19, %s961_s19, %s962_s20  }
  0x23   :  { %954 = dma.done.wait [#allocation3], 256  }
  0x24   :  { %955 = vsyncadd [#allocation3], 4294967040 }
  0x25   :  { %956 = dma.done.wait [#allocation6], 256  }
  0x26   :  { %957 = vsyncadd [#allocation6], 4294967040  ;;  %v50_v0 = vlaneseq  ;;  %v1021_v2 = vld [vmem:[#allocation5] sm:$0xff]  ;;  %v1027_v3 = vld [vmem:[#allocation5 + $0x8] sm:$0xff]  ;;  %s964_s1 = smov 127   ;;  %s965_s6 = smov 1  }
  0x27   :  { %v68_v4 = vrot.slane %v1021_v2, 1  ;;  %v89_v5 = vrot.slane %v1021_v2, 7  ;;  %v154_v6 = vrot.slane %v1021_v2, 2  ;;  %v175_v7 = vrot.slane %v1021_v2, 6  ;;  %v1037_v12 = vld [vmem:[#allocation2] sm:$0xff]  ;;  %v1044_v17 = vld [vmem:[#allocation2 + $0x8] sm:$0xff] }
  0x28   :  { %v1013_v1 = vshrl.u32 %v50_v0, 7  ;;  %v73_v8 = vrot.slane %v1027_v3, 1  ;;  %v94_v9 = vrot.slane %v1027_v3, 7  ;;  %v159_v10 = vrot.slane %v1027_v3, 2  ;;  %s966_s7 = smov 126   ;;  %s967_s8 = smov 2  }
  0x29   :  { %v180_v11 = vrot.slane %v1027_v3, 6  ;;  %v240_v13 = vrot.slane %v1021_v2, 3  ;;  %v245_v14 = vrot.slane %v1027_v3, 3  ;;  %v261_v15 = vrot.slane %v1021_v2, 5  ;;  %s968_s9 = smov 125   ;;  %s969_s10 = smov 3  }
  0x2a   :  { %vm77_vm0 = vcmp.lt.s32.totalorder %v1013_v1, 7  ;;  %vm98_vm1 = vcmp.lt.s32.totalorder %v1013_v1, 1  ;;  %vm131_vm2 = vcmp.ge.s32.totalorder %v1013_v1, 1  ;;  %vm163_vm3 = vcmp.lt.s32.totalorder %v1013_v1, 6  ;;  %s970_s11 = smov 124   ;;  %s971_s12 = smov 4  }
  0x2b   :  { %vm184_vm4 = vcmp.lt.s32.totalorder %v1013_v1, 2  ;;  %vm217_vm5 = vcmp.ge.s32.totalorder %v1013_v1, 2  ;;  %vm249_vm6 = vcmp.lt.s32.totalorder %v1013_v1, 5  ;;  %vm270_vm7 = vcmp.lt.s32.totalorder %v1013_v1, 3  ;;  %s972_s13 = smov [#allocation7]  }
  0x2c   :  { %vm303_vm8 = vcmp.ge.s32.totalorder %v1013_v1, 3  ;;  %vm335_vm9 = vcmp.lt.s32.totalorder %v1013_v1, 4  ;;  %v266_v16 = vrot.slane %v1027_v3, 5  ;;  %vm368_vm10 = vcmp.ge.s32.totalorder %v1013_v1, 4  ;;  %s859_s14 = sshll.u32 %s972_s13, 4  ;;  %s860_s14 = int_to_ptr.vmem [resolvable:$true] %s859_s14 }
  0x2d   :  { %v79_v18 = vsel %vm77_vm0, %v68_v4, %v73_v8  ;;  %v105_v19 = vsel %vm98_vm1, %v94_v9, %v89_v5  ;;  %v191_v20 = vsel %vm184_vm4, %v180_v11, %v175_v7  ;;  %v1059_v21 = vadd.s32 8, %v1013_v1  ;;  %s932_s16 = scalar_lea.vmem %s860_s14, 128  ;;  %p937_p3 = scmp.lt.s32.totalorder %s860_s14, %s860_s14 }
  0x2e   :  { %v122_v22 = vadd.f32 %v79_v18, %v1021_v2  ;;  %v134_v23 = vsel %vm131_vm2, %v105_v19, 0.0  ;;  %v165_v24 = vsel %vm163_vm3, %v154_v6, %v159_v10  ;;  %v220_v25 = vsel %vm217_vm5, %v191_v20, 0.0  ;;  %p933_p2 = scmp.ne.s32.totalorder %s860_s14, %s932_s16  ;;  %p938_p4 = scmp.lt.s32.totalorder %s932_s16, %s932_s16 }
  0x2f   :  { %v277_v26 = vsel %vm270_vm7, %v266_v16, %v261_v15  ;;  %v326_v27 = vrot.slane %v1021_v2, 4  ;;  %v331_v28 = vrot.slane %v1027_v3, 4  ;;  %v67_v29 = vrot.slane %v1037_v12, 1 }
  0x30   :  { %v144_v30 = vadd.f32 %v134_v23, %v122_v22  ;;  %v251_v31 = vsel %vm249_vm6, %v240_v13, %v245_v14  ;;  %v72_v32 = vrot.slane %v1044_v17, 1  ;;  %v88_v33 = vrot.slane %v1037_v12, 7  ;;  %p939_p5 = por %p938_p4, %p937_p3 }
  0x31   :  { %v306_v34 = vsel %vm303_vm8, %v277_v26, 0.0  ;;  %v1093_v35 = vsel %vm335_vm9, %v326_v27, %v331_v28  ;;  %v93_v36 = vrot.slane %v1044_v17, 7  ;;  %v153_v37 = vrot.slane %v1037_v12, 2 }
  0x32   :  { %v208_v38 = vadd.f32 %v165_v24, %v144_v30  ;;  %v342_v39 = vsel %vm335_vm9, %v331_v28, %v326_v27  ;;  %v78_v40 = vsel %vm77_vm0, %v67_v29, %v72_v32  ;;  %v158_v41 = vrot.slane %v1044_v17, 2  ;;  %p940_p6 = pnand %p939_p5, %p933_p2 }
  0x33   :  { %v104_v42 = vsel %vm98_vm1, %v93_v36, %v88_v33  ;;  %v121_v43 = vadd.f32 %v78_v40, %v1037_v12  ;;  %v174_v44 = vrot.slane %v1037_v12, 6  ;;  %v179_v45 = vrot.slane %v1044_v17, 6 }
  0x34   :  { %v230_v46 = vadd.f32 %v220_v25, %v208_v38  ;;  %v133_v47 = vsel %vm131_vm2, %v104_v42, 0.0  ;;  %v164_v48 = vsel %vm163_vm3, %v153_v37, %v158_v41  ;;  %v239_v49 = vrot.slane %v1037_v12, 3 }
  0x35   :  { %v143_v50 = vadd.f32 %v133_v47, %v121_v43  ;;  %v190_v51 = vsel %vm184_vm4, %v179_v45, %v174_v44  ;;  %v244_v52 = vrot.slane %v1044_v17, 3  ;;  %v260_v53 = vrot.slane %v1037_v12, 5 }
  0x36   :  { %v294_v54 = vadd.f32 %v251_v31, %v230_v46  ;;  %v219_v55 = vsel %vm217_vm5, %v190_v51, 0.0  ;;  %v265_v56 = vrot.slane %v1044_v17, 5  ;;  %v325_v57 = vrot.slane %v1037_v12, 4 }
  0x37   :  { %v371_v58 = vsel %vm368_vm10, %v342_v39, 0.0  ;;  %v207_v59 = vadd.f32 %v164_v48, %v143_v50  ;;  %v330_v60 = vrot.slane %v1044_v17, 4  ;;  %v84_v61 = vsel %vm77_vm0, %v73_v8, %v68_v4 }
  0x38   :  { %v316_v62 = vadd.f32 %v306_v34, %v294_v54  ;;  %v250_v63 = vsel %vm249_vm6, %v239_v49, %v244_v52  ;;  %v276_v18 = vsel %vm270_vm7, %v265_v56, %v260_v53  ;;  %vm110_vm11 = vcmp.lt.s32.totalorder %v1059_v21, 15 }
  0x39   :  { %v229_v19 = vadd.f32 %v219_v55, %v207_v59  ;;  %v305_v20 = vsel %vm303_vm8, %v276_v18, 0.0  ;;  %v341_v22 = vsel %vm335_vm9, %v330_v60, %v325_v57  ;;  %v100_v4 = vsel %vm98_vm1, %v89_v5, %v94_v9 }
  0x3a   :  { %v359_v8 = vadd.f32 %v1093_v35, %v316_v62  ;;  %v1141_v23 = vsel %vm335_vm9, %v325_v57, %v330_v60  ;;  %v117_v24 = vsel %vm110_vm11, %v84_v61, 0.0  ;;  %v170_v25 = vsel %vm163_vm3, %v159_v10, %v154_v6 }
  0x3b   :  { %v293_v26 = vadd.f32 %v250_v63, %v229_v19  ;;  %v370_v5 = vsel %vm368_vm10, %v341_v22, 0.0  ;;  %v127_v9 = vadd.f32 %v117_v24, %v1027_v3  ;;  %vm196_vm12 = vcmp.lt.s32.totalorder %v1059_v21, 14 }
  0x3c   :  { %v1155_v27 = vadd.f32 %v371_v58, %v359_v8  ;;  %v186_v28 = vsel %vm184_vm4, %v175_v7, %v180_v11  ;;  %v203_v6 = vsel %vm196_vm12, %v170_v25, 0.0  ;;  %v256_v10 = vsel %vm249_vm6, %v245_v14, %v240_v13 }
  0x3d   :  { %v315_v30 = vadd.f32 %v305_v20, %v293_v26  ;;  %v149_v31 = vadd.f32 %v127_v9, %v100_v4  ;;  %vm282_vm13 = vcmp.lt.s32.totalorder %v1059_v21, 13  ;;  %vm347_vm14 = vcmp.lt.s32.totalorder %v1059_v21, 12 }
  0x3e   :  { %394 = vrot.lane.b32.xlu1 %v1155_v27, %s964_s1  ;;  %v272_v7 = vsel %vm270_vm7, %v261_v15, %v266_v16  ;;  %v289_v11 = vsel %vm282_vm13, %v256_v10, 0.0  ;;  %v83_v13 = vsel %vm77_vm0, %v72_v32, %v67_v29  ;;  %v99_v14 = vsel %vm98_vm1, %v88_v33, %v93_v36 }
  0x3f   :  { %v358_v34 = vadd.f32 %v1141_v23, %v315_v30  ;;  %v213_v38 = vadd.f32 %v203_v6, %v149_v31  ;;  %v116_v40 = vsel %vm110_vm11, %v83_v13, 0.0  ;;  %v169_v42 = vsel %vm163_vm3, %v158_v41, %v153_v37 }
  0x40   :  { %v354_v15 = vsel %vm347_vm14, %v342_v39, 0.0  ;;  %v126_v16 = vadd.f32 %v116_v40, %v1044_v17  ;;  %v185_v29 = vsel %vm184_vm4, %v174_v44, %v179_v45  ;;  %v255_v32 = vsel %vm249_vm6, %v244_v52, %v239_v49 }
  0x41   :  { %v1199_v33 = vadd.f32 %v370_v5, %v358_v34  ;;  %v235_v36 = vadd.f32 %v213_v38, %v186_v28  ;;  %v202_v43 = vsel %vm196_vm12, %v169_v42, 0.0  ;;  %v271_v37 = vsel %vm270_vm7, %v260_v53, %v265_v56 }
  0x42   :  { %v148_v41 = vadd.f32 %v126_v16, %v99_v14  ;;  %v288_v39 = vsel %vm282_vm13, %v255_v32, 0.0  ;;  %v44_v46 = vmul.f32 %v1037_v12, %v1037_v12  ;;  %v45_v44 = vmul.f32 %v1044_v17, %v1044_v17 }
  0x43   :  { %390 = vrot.lane.b32.xlu0 %v1199_v33, %s964_s1  ;;  %v299_v45 = vadd.f32 %v289_v11, %v235_v36  ;;  %v353_v47 = vsel %vm347_vm14, %v341_v22, 0.0  ;;  %v1217_v48 = vmul.f32 %v1021_v2, %v1037_v12  ;;  %v1221_v49 = vmul.f32 %v1027_v3, %v1044_v17 }
  0x44   :  { %v212_v50 = vadd.f32 %v202_v43, %v148_v41  ;;  %v69_v51 = vrot.slane %v44_v46, 1  ;;  %v74_v52 = vrot.slane %v45_v44, 1  ;;  %v90_v53 = vrot.slane %v44_v46, 7 }
  0x45   :  { %v321_v54 = vadd.f32 %v299_v45, %v272_v7  ;;  %v95_v55 = vrot.slane %v45_v44, 7  ;;  %v155_v56 = vrot.slane %v44_v46, 2  ;;  %v160_v57 = vrot.slane %v45_v44, 2 }
  0x46   :  { %v234_v58 = vadd.f32 %v212_v50, %v185_v29  ;;  %v85_v59 = vsel %vm77_vm0, %v74_v52, %v69_v51  ;;  %v176_v60 = vrot.slane %v44_v46, 6  ;;  %v181_v61 = vrot.slane %v45_v44, 6 }
  0x47   :  { %v364_v12 = vadd.f32 %v354_v15, %v321_v54  ;;  %421 = vrot.lane.b32.xlu0 %v1199_v33, %s965_s6  ;;  %v101_v17 = vsel %vm98_vm1, %v90_v53, %v95_v55  ;;  %v118_v62 = vsel %vm110_vm11, %v85_v59, 0.0  ;;  %v171_v63 = vsel %vm163_vm3, %v160_v57, %v155_v56 }
  0x48   :  { %v298_v18 = vadd.f32 %v288_v39, %v234_v58  ;;  %v128_v19 = vadd.f32 %v118_v62, %v45_v44  ;;  %v187_v20 = vsel %vm184_vm4, %v176_v60, %v181_v61  ;;  %v204_v22 = vsel %vm196_vm12, %v171_v63, 0.0 }
  0x49   :  { %v1238_v4 = vadd.f32 %v364_v12, %v1093_v35  ;;  %v241_v8 = vrot.slane %v44_v46, 3  ;;  %v246_v24 = vrot.slane %v45_v44, 3  ;;  %v262_v25 = vrot.slane %v44_v46, 5 }
  0x4a   :  { %v320_v26 = vadd.f32 %v298_v18, %v271_v37  ;;  %v150_v5 = vadd.f32 %v128_v19, %v101_v17  ;;  %v267_v9 = vrot.slane %v45_v44, 5  ;;  %v327_v28 = vrot.slane %v44_v46, 4 }
  0x4b   :  { %396 = vrot.lane.b32.xlu1 %v1238_v4, %s964_s1  ;;  %425 = vrot.lane.b32.xlu0 %v1155_v27, %s965_s6  ;;  %v257_v6 = vsel %vm249_vm6, %v246_v24, %v241_v8  ;;  %v332_v10 = vrot.slane %v45_v44, 4  ;;  %v80_v35 = vsel %vm77_vm0, %v69_v51, %v74_v52  ;;  %v106_v30 = vsel %vm98_vm1, %v95_v55, %v90_v53 }
  0x4c   :  { %v363_v31 = vadd.f32 %v353_v47, %v320_v26  ;;  %v214_v7 = vadd.f32 %v204_v22, %v150_v5  ;;  %v273_v11 = vsel %vm270_vm7, %v262_v25, %v267_v9  ;;  %v290_v13 = vsel %vm282_vm13, %v257_v6, 0.0 }
  0x4d   :  { %v338_v14 = vsel %vm335_vm9, %v327_v28, %v332_v10  ;;  %v343_v34 = vsel %vm335_vm9, %v332_v10, %v327_v28  ;;  %v123_v38 = vadd.f32 %v80_v35, %v44_v46  ;;  %v135_v40 = vsel %vm131_vm2, %v106_v30, 0.0 }
  0x4e   :  { %v1261_v42 = vadd.f32 %v363_v31, %v1141_v23  ;;  %v236_v15 = vadd.f32 %v214_v7, %v187_v20  ;;  %v355_v16 = vsel %vm347_vm14, %v343_v34, 0.0  ;;  %v166_v29 = vsel %vm163_vm3, %v155_v56, %v160_v57 }
  0x4f   :  { %v145_v32 = vadd.f32 %v135_v40, %v123_v38  ;;  %v192_v36 = vsel %vm184_vm4, %v181_v61, %v176_v60  ;;  %v252_v43 = vsel %vm249_vm6, %v241_v8, %v246_v24  ;;  %v278_v37 = vsel %vm270_vm7, %v267_v9, %v262_v25 }
  0x50   :  { %423 = vrot.lane.b32.xlu1 %v1261_v42, %s965_s6  ;;  %392 = vrot.lane.b32.xlu0 %v1261_v42, %s964_s1  ;;  %v300_v23 = vadd.f32 %v290_v13, %v236_v15  ;;  %v221_v41 = vsel %vm217_vm5, %v192_v36, 0.0  ;;  %v307_v39 = vsel %vm303_vm8, %v278_v37, 0.0  ;;  %v372_v46 = vsel %vm368_vm10, %v343_v34, 0.0 }
  0x51   :  { %v209_v44 = vadd.f32 %v166_v29, %v145_v32  ;;  %v71_v45 = vrot.slane %v1217_v48, 1  ;;  %v76_v47 = vrot.slane %v1221_v49, 1  ;;  %v92_v50 = vrot.slane %v1217_v48, 7 }
  0x52   :  { %v322_v51 = vadd.f32 %v300_v23, %v273_v11  ;;  %v97_v52 = vrot.slane %v1221_v49, 7  ;;  %v157_v53 = vrot.slane %v1217_v48, 2  ;;  %v162_v54 = vrot.slane %v1221_v49, 2 }
  0x53   :  { %v231_v55 = vadd.f32 %v221_v41, %v209_v44  ;;  %v87_v56 = vsel %vm77_vm0, %v76_v47, %v71_v45  ;;  %v178_v57 = vrot.slane %v1217_v48, 6  ;;  %v183_v58 = vrot.slane %v1221_v49, 6 }
  0x54   :  { %427 = vrot.lane.b32.xlu1 %v1238_v4, %s965_s6  ;;  %v365_v59 = vadd.f32 %v355_v16, %v322_v51  ;;  %v103_v60 = vsel %vm98_vm1, %v92_v50, %v97_v52  ;;  %v120_v61 = vsel %vm110_vm11, %v87_v56, 0.0  ;;  %v173_v12 = vsel %vm163_vm3, %v162_v54, %v157_v53 }
  0x55   :  { %v295_v17 = vadd.f32 %v252_v43, %v231_v55  ;;  %v130_v62 = vadd.f32 %v120_v61, %v1221_v49  ;;  %v189_v63 = vsel %vm184_vm4, %v178_v57, %v183_v58  ;;  %v206_v18 = vsel %vm196_vm12, %v173_v12, 0.0 }
  0x56   :  { %v1306_v19 = vadd.f32 %v365_v59, %v338_v14  ;;  %v243_v20 = vrot.slane %v1217_v48, 3  ;;  %v248_v22 = vrot.slane %v1221_v49, 3  ;;  %v264_v8 = vrot.slane %v1217_v48, 5 }
  0x57   :  { %v317_v24 = vadd.f32 %v307_v39, %v295_v17  ;;  %v152_v25 = vadd.f32 %v130_v62, %v103_v60  ;;  %v269_v26 = vrot.slane %v1221_v49, 5  ;;  %v329_v5 = vrot.slane %v1217_v48, 4 }
  0x58   :  { %400 = vrot.lane.b32.xlu1 %v1306_v19, %s964_s1  ;;  %v259_v9 = vsel %vm249_vm6, %v248_v22, %v243_v20  ;;  %v334_v28 = vrot.slane %v1221_v49, 4  ;;  %v82_v6 = vsel %vm77_vm0, %v71_v45, %v76_v47  ;;  %v108_v10 = vsel %vm98_vm1, %v97_v52, %v92_v50 }
  0x59   :  { %v360_v35 = vadd.f32 %v338_v14, %v317_v24  ;;  %v216_v30 = vadd.f32 %v206_v18, %v152_v25  ;;  %v1324_v31 = vmul.f32 %v1021_v2, %v1021_v2  ;;  %v292_v7 = vsel %vm282_vm13, %v259_v9, 0.0 }
  0x5a   :  { %v345_v11 = vsel %vm335_vm9, %v334_v28, %v329_v5  ;;  %v125_v49 = vadd.f32 %v82_v6, %v1217_v48  ;;  %v137_v13 = vsel %vm131_vm2, %v108_v10, 0.0  ;;  %v168_v14 = vsel %vm163_vm3, %v157_v53, %v162_v54 }
  0x5b   :  { %v1333_v34 = vadd.f32 %v372_v46, %v360_v35  ;;  %v238_v38 = vadd.f32 %v216_v30, %v189_v63  ;;  %v275_v2 = vsel %vm270_vm7, %v264_v8, %v269_v26  ;;  %v194_v15 = vsel %vm184_vm4, %v183_v58, %v178_v57 }
  0x5c   :  { %v147_v40 = vadd.f32 %v137_v13, %v125_v49  ;;  %v340_v16 = vsel %vm335_vm9, %v329_v5, %v334_v28  ;;  %v357_v29 = vsel %vm347_vm14, %v345_v11, 0.0  ;;  %v223_v32 = vsel %vm217_vm5, %v194_v15, 0.0 }
  0x5d   :  { %398 = vrot.lane.b32.xlu0 %v1333_v34, %s964_s1  ;;  %v302_v48 = vadd.f32 %v292_v7, %v238_v38  ;;  %v280_v43 = vsel %vm270_vm7, %v269_v26, %v264_v8  ;;  %v47_v37 = vmul.f32 %v1027_v3, %v1027_v3  ;;  %v70_v23 = vrot.slane %v1324_v31, 1 }
  0x5e   :  { %v211_v36 = vadd.f32 %v168_v14, %v147_v40  ;;  %v254_v39 = vsel %vm249_vm6, %v243_v20, %v248_v22  ;;  %v91_v46 = vrot.slane %v1324_v31, 7  ;;  %v156_v44 = vrot.slane %v1324_v31, 2 }
  0x5f   :  { %v324_v41 = vadd.f32 %v302_v48, %v275_v2  ;;  %v75_v47 = vrot.slane %v47_v37, 1  ;;  %v96_v50 = vrot.slane %v47_v37, 7  ;;  %v161_v51 = vrot.slane %v47_v37, 2 }
  0x60   :  { %v233_v45 = vadd.f32 %v223_v32, %v211_v36  ;;  %v309_v53 = vsel %vm303_vm8, %v280_v43, 0.0  ;;  %v242_v3 = vrot.slane %v1324_v31, 3  ;;  %v247_v54 = vrot.slane %v47_v37, 3 }
  0x61   :  { %v367_v52 = vadd.f32 %v357_v29, %v324_v41  ;;  %v86_v56 = vsel %vm77_vm0, %v75_v47, %v70_v23  ;;  %v172_v57 = vsel %vm163_vm3, %v161_v51, %v156_v44  ;;  %v177_v58 = vrot.slane %v1324_v31, 6 }
  0x62   :  { %v297_v55 = vadd.f32 %v254_v39, %v233_v45  ;;  %v102_v60 = vsel %vm98_vm1, %v91_v46, %v96_v50  ;;  %v119_v61 = vsel %vm110_vm11, %v86_v56, 0.0  ;;  %v182_v12 = vrot.slane %v47_v37, 6 }
  0x63   :  { %v1366_v59 = vadd.f32 %v367_v52, %v340_v16  ;;  %v374_v62 = vsel %vm368_vm10, %v345_v11, 0.0  ;;  %v129_v63 = vadd.f32 %v119_v61, %v47_v37  ;;  %v263_v18 = vrot.slane %v1324_v31, 5 }
  0x64   :  { %v319_v17 = vadd.f32 %v309_v53, %v297_v55  ;;  %v205_v20 = vsel %vm196_vm12, %v172_v57, 0.0  ;;  %v258_v22 = vsel %vm249_vm6, %v247_v54, %v242_v3  ;;  %v328_v8 = vrot.slane %v1324_v31, 4 }
  0x65   :  { %439 = vrot.lane.b32.xlu1 %v1366_v59, %s965_s6  ;;  %v81_v24 = vsel %vm77_vm0, %v70_v23, %v75_v47  ;;  %v151_v26 = vadd.f32 %v129_v63, %v102_v60  ;;  %v333_v5 = vrot.slane %v47_v37, 4  ;;  %v107_v9 = vsel %vm98_vm1, %v96_v50, %v91_v46 }
  0x66   :  { %v362_v25 = vadd.f32 %v340_v16, %v319_v17  ;;  %v188_v28 = vsel %vm184_vm4, %v177_v58, %v182_v12  ;;  %v268_v6 = vrot.slane %v47_v37, 5  ;;  %v124_v10 = vadd.f32 %v81_v24, %v1324_v31 }
  0x67   :  { %v136_v35 = vsel %vm131_vm2, %v107_v9, 0.0  ;;  %v215_v7 = vadd.f32 %v205_v20, %v151_v26  ;;  %v167_v11 = vsel %vm163_vm3, %v156_v44, %v161_v51  ;;  %v291_v49 = vsel %vm282_vm13, %v258_v22, 0.0 }
  0x68   :  { %v1391_v30 = vadd.f32 %v374_v62, %v362_v25  ;;  %v146_v13 = vadd.f32 %v136_v35, %v124_v10  ;;  %v193_v38 = vsel %vm184_vm4, %v182_v12, %v177_v58  ;;  %v344_v14 = vsel %vm335_vm9, %v333_v5, %v328_v8 }
  0x69   :  { %v237_v31 = vadd.f32 %v215_v7, %v188_v28  ;;  %v222_v2 = vsel %vm217_vm5, %v193_v38, 0.0  ;;  %v274_v40 = vsel %vm270_vm7, %v263_v18, %v268_v6  ;;  %v279_v48 = vsel %vm270_vm7, %v268_v6, %v263_v18 }
  0x6a   :  { %437 = vrot.lane.b32.xlu0 %v1391_v30, %s965_s6  ;;  %v210_v15 = vadd.f32 %v167_v11, %v146_v13  ;;  %v253_v29 = vsel %vm249_vm6, %v242_v3, %v247_v54  ;;  %v356_v32 = vsel %vm347_vm14, %v344_v14, 0.0  ;;  %v308_v37 = vsel %vm303_vm8, %v279_v48, 0.0 }
  0x6b   :  { %v301_v16 = vadd.f32 %v291_v49, %v237_v31  ;;  %v339_v41 = vsel %vm335_vm9, %v328_v8, %v333_v5  ;;  %v373_v45 = vsel %vm368_vm10, %v344_v14, 0.0  ;;  %v1468_v1 = vand.u32 127, %v50_v0 }
  0x6c   :  { %v232_v36 = vadd.f32 %v222_v2, %v210_v15 }
  0x6d   :  { %v323_v43 = vadd.f32 %v301_v16, %v274_v40  ;;  %vm410_vm15 = vcmp.lt.s32.totalorder %v1468_v1, 127  ;;  %vm441_vm0 = vcmp.lt.s32.totalorder %v1468_v1, 1  ;;  %v1507_v60 = vand.u32 15, %v1468_v1 }
  0x6e   :  { %v296_v23 = vadd.f32 %v253_v29, %v232_v36  ;;  %vm514_vm3 = vcmp.lt.s32.totalorder %v1468_v1, 126  ;;  %vm545_vm5 = vcmp.lt.s32.totalorder %v1468_v1, 2  ;;  %vm618_vm7 = vcmp.lt.s32.totalorder %v1468_v1, 125 }
  0x6f   :  { %v366_v39 = vadd.f32 %v356_v32, %v323_v43  ;;  %vm452_vm1 = vcmp.lt.s32.totalorder %v1507_v60, 15  ;;  %vm473_vm2 = vcmp.ge.s32.totalorder %v1507_v60, 1  ;;  %vm556_vm4 = vcmp.lt.s32.totalorder %v1507_v60, 14 }
  0x70   :  { %v318_v46 = vadd.f32 %v308_v37, %v296_v23  ;;  %vm577_vm6 = vcmp.ge.s32.totalorder %v1507_v60, 2  ;;  %vm660_vm8 = vcmp.lt.s32.totalorder %v1507_v60, 13  ;;  %vm649_vm9 = vcmp.lt.s32.totalorder %v1468_v1, 3 }
  0x71   :  { %v1417_v44 = vadd.f32 %v366_v39, %v339_v41  ;;  %vm681_vm10 = vcmp.ge.s32.totalorder %v1507_v60, 3  ;;  %vm722_vm11 = vcmp.lt.s32.totalorder %v1468_v1, 124  ;;  %vm764_vm12 = vcmp.lt.s32.totalorder %v1507_v60, 12 }
  0x72   :  { %v361_v47 = vadd.f32 %v339_v41, %v318_v46  ;;  %vm753_vm13 = vcmp.lt.s32.totalorder %v1468_v1, 4  ;;  %vm785_vm14 = vcmp.ge.s32.totalorder %v1507_v60, 4 }
  0x73   :  { %404 = vrot.lane.b32.xlu1 %v1417_v44, %s964_s1 }
  0x74   :  { %v1423_v21 = vadd.f32 %v373_v45, %v361_v47 }
  0x76   :  { %402 = vrot.lane.b32.xlu0 %v1423_v21, %s964_s1 }
  0x77   :  { %408 = vrot.lane.b32.xlu1 %v1366_v59, %s964_s1 }
  0x7a   :  { %406 = vrot.lane.b32.xlu0 %v1391_v30, %s964_s1 }
  0x7b   :  { %496 = vrot.lane.b32.xlu1 %v1261_v42, %s966_s7 }
  0x7e   :  { %494 = vrot.lane.b32.xlu0 %v1199_v33, %s966_s7 }
  0x7f   :  { %500 = vrot.lane.b32.xlu1 %v1238_v4, %s966_s7 }
  0x82   :  { %498 = vrot.lane.b32.xlu0 %v1155_v27, %s966_s7 }
  0x83   :  { %504 = vrot.lane.b32.xlu1 %v1306_v19, %s966_s7 }
  0x86   :  { %502 = vrot.lane.b32.xlu0 %v1333_v34, %s966_s7 }
  0x87   :  { %431 = vrot.lane.b32.xlu1 %v1306_v19, %s965_s6 }
  0x8a   :  { %429 = vrot.lane.b32.xlu0 %v1333_v34, %s965_s6 }
  0x8b   :  { %435 = vrot.lane.b32.xlu1 %v1417_v44, %s965_s6 }
  0x8e   :  { %433 = vrot.lane.b32.xlu0 %v1423_v21, %s965_s6 }
  0x8f   :  { %527 = vrot.lane.b32.xlu1 %v1261_v42, %s967_s8 }
  0x92   :  { %525 = vrot.lane.b32.xlu0 %v1199_v33, %s967_s8 }
  0x93   :  { %531 = vrot.lane.b32.xlu1 %v1238_v4, %s967_s8 }
  0x96   :  { %529 = vrot.lane.b32.xlu0 %v1155_v27, %s967_s8 }
  0x97   :  { %543 = vrot.lane.b32.xlu1 %v1366_v59, %s967_s8 }
  0x9a   :  { %541 = vrot.lane.b32.xlu0 %v1391_v30, %s967_s8 }
  0x9b   :  { %508 = vrot.lane.b32.xlu1 %v1417_v44, %s966_s7 }
  0x9e   :  { %506 = vrot.lane.b32.xlu0 %v1423_v21, %s966_s7 }
  0x9f   :  { %512 = vrot.lane.b32.xlu1 %v1366_v59, %s966_s7 }
  0xa2   :  { %510 = vrot.lane.b32.xlu0 %v1391_v30, %s966_s7 }
  0xa3   :  { %600 = vrot.lane.b32.xlu1 %v1261_v42, %s968_s9 }
  0xa6   :  { %598 = vrot.lane.b32.xlu0 %v1199_v33, %s968_s9 }
  0xa7   :  { %604 = vrot.lane.b32.xlu1 %v1238_v4, %s968_s9 }
  0xaa   :  { %602 = vrot.lane.b32.xlu0 %v1155_v27, %s968_s9 }
  0xab   :  { %608 = vrot.lane.b32.xlu1 %v1306_v19, %s968_s9 }
  0xae   :  { %606 = vrot.lane.b32.xlu0 %v1333_v34, %s968_s9 }
  0xaf   :  { %535 = vrot.lane.b32.xlu1 %v1306_v19, %s967_s8 }
  0xb0   :  { %v395_v50 = vpop.permute.xlu1 %394 }
  0xb2   :  { %533 = vrot.lane.b32.xlu0 %v1333_v34, %s967_s8 }
  0xb3   :  { %539 = vrot.lane.b32.xlu1 %v1417_v44, %s967_s8 }
  0xb5   :  { %v1474_v51 = vpop.permute.xlu0 %390 }
  0xb6   :  { %v417_v52 = vsel %vm410_vm15, %v1474_v51, %v395_v50  ;;  %537 = vrot.lane.b32.xlu0 %v1423_v21, %s967_s8 }
  0xb7   :  { %631 = vrot.lane.b32.xlu1 %v1261_v42, %s969_s10  ;;  %v453_v7 = vsel %vm452_vm1, %v417_v52, 0.0 }
  0xb8   :  { %v463_v13 = vadd.f32 %v453_v7, %v1199_v33 }
  0xb9   :  { %v422_v0 = vpop.permute.xlu0 %421 }
  0xba   :  { %629 = vrot.lane.b32.xlu0 %v1199_v33, %s969_s10 }
  0xbb   :  { %635 = vrot.lane.b32.xlu1 %v1238_v4, %s969_s10 }
  0xbd   :  { %v397_v53 = vpop.permute.xlu1 %396  ;;  %v1487_v3 = vpop.permute.xlu0 %425 }
  0xbe   :  { %v448_v54 = vsel %vm441_vm0, %v422_v0, %v1487_v3  ;;  %633 = vrot.lane.b32.xlu0 %v1155_v27, %s969_s10 }
  0xbf   :  { %647 = vrot.lane.b32.xlu1 %v1366_v59, %s969_s10  ;;  %v475_v26 = vsel %vm473_vm2, %v448_v54, 0.0 }
  0xc2   :  { %v424_v55 = vpop.permute.xlu1 %423  ;;  %v393_v56 = vpop.permute.xlu0 %392  ;;  %645 = vrot.lane.b32.xlu0 %v1391_v30, %s969_s10 }
  0xc3   :  { %v418_v57 = vsel %vm410_vm15, %v393_v56, %v397_v53  ;;  %612 = vrot.lane.b32.xlu1 %v1417_v44, %s968_s9 }
  0xc4   :  { %v458_v9 = vsel %vm452_vm1, %v418_v57, 0.0 }
  0xc5   :  { %v468_v6 = vadd.f32 %v458_v9, %v1261_v42 }
  0xc6   :  { %v1502_v58 = vpop.permute.xlu1 %427  ;;  %610 = vrot.lane.b32.xlu0 %v1423_v21, %s968_s9 }
  0xc7   :  { %v449_v61 = vsel %vm441_vm0, %v424_v55, %v1502_v58  ;;  %616 = vrot.lane.b32.xlu1 %v1366_v59, %s968_s9 }
  0xc8   :  { %v480_v18 = vsel %vm473_vm2, %v449_v61, 0.0 }
  0xca   :  { %v401_v12 = vpop.permute.xlu1 %400  ;;  %614 = vrot.lane.b32.xlu0 %v1391_v30, %s968_s9 }
  0xcb   :  { %v416_v17 = vsel %vm410_vm15, %v397_v53, %v401_v12  ;;  %704 = vrot.lane.b32.xlu1 %v1261_v42, %s970_s11 }
  0xcc   :  { %v459_v62 = vsel %vm452_vm1, %v416_v17, 0.0 }
  0xcd   :  { %v469_v63 = vadd.f32 %v459_v62, %v1238_v4 }
  0xce   :  { %702 = vrot.lane.b32.xlu0 %v1199_v33, %s970_s11 }
  0xcf   :  { %v399_v20 = vpop.permute.xlu0 %398  ;;  %v1529_v22 = vadd.f32 %v480_v18, %v469_v63  ;;  %708 = vrot.lane.b32.xlu1 %v1238_v4, %s970_s11 }
  0xd0   :  { %v415_v8 = vsel %vm410_vm15, %v395_v50, %v399_v20 }
  0xd1   :  { %v454_v24 = vsel %vm452_vm1, %v415_v8, 0.0 }
  0xd2   :  { %v464_v25 = vadd.f32 %v454_v24, %v1155_v27  ;;  %706 = vrot.lane.b32.xlu0 %v1155_v27, %s970_s11 }
  0xd3   :  { %712 = vrot.lane.b32.xlu1 %v1306_v19, %s970_s11 }
  0xd4   :  { %v1544_v5 = vadd.f32 %v475_v26, %v464_v25 }
  0xd6   :  { %710 = vrot.lane.b32.xlu0 %v1333_v34, %s970_s11 }
  0xd7   :  { %v1550_v28 = vpop.permute.xlu1 %439  ;;  %639 = vrot.lane.b32.xlu1 %v1306_v19, %s969_s10 }
  0xd8   :  { %v451_v10 = vsel %vm441_vm0, %v1550_v28, %v424_v55 }
  0xd9   :  { %v479_v35 = vsel %vm473_vm2, %v451_v10, 0.0 }
  0xda   :  { %v489_v11 = vadd.f32 %v479_v35, %v468_v6  ;;  %637 = vrot.lane.b32.xlu0 %v1333_v34, %s969_s10 }
  0xdb   :  { %643 = vrot.lane.b32.xlu1 %v1417_v44, %s969_s10 }
  0xdc   :  { %v1566_v49 = vpop.permute.xlu0 %437 }
  0xdd   :  { %v450_v38 = vsel %vm441_vm0, %v1566_v49, %v422_v0 }
  0xde   :  { %v474_v31 = vsel %vm473_vm2, %v450_v38, 0.0  ;;  %641 = vrot.lane.b32.xlu0 %v1423_v21, %s969_s10 }
  0xdf   :  { %v484_v14 = vadd.f32 %v474_v31, %v463_v13  ;;  %735 = vrot.lane.b32.xlu1 %v1261_v42, %s971_s12 }
  0xe2   :  { %733 = vrot.lane.b32.xlu0 %v1199_v33, %s971_s12 }
  0xe3   :  { %739 = vrot.lane.b32.xlu1 %v1238_v4, %s971_s12 }
  0xe5   :  { %v405_v2 = vpop.permute.xlu1 %404 }
  0xe6   :  { %737 = vrot.lane.b32.xlu0 %v1155_v27, %s971_s12  ;;  %v414_v40 = vsel %vm410_vm15, %v401_v12, %v405_v2 }
  0xe7   :  { %751 = vrot.lane.b32.xlu1 %v1366_v59, %s971_s12  ;;  %v460_v47 = vsel %vm452_vm1, %v414_v40, 0.0 }
  0xe8   :  { %v403_v15 = vpop.permute.xlu0 %402  ;;  %v470_v55 = vadd.f32 %v460_v47, %v1306_v19 }
  0xe9   :  { %v413_v42 = vsel %vm410_vm15, %v399_v20, %v403_v15  ;;  %v409_v48 = vpop.permute.xlu1 %408 }
  0xea   :  { %749 = vrot.lane.b32.xlu0 %v1391_v30, %s971_s12  ;;  %v412_v33 = vsel %vm410_vm15, %v405_v2, %v409_v48  ;;  %v420_v27 = vsel %vm410_vm15, %v409_v48, %v393_v56  ;;  %v455_v56 = vsel %vm452_vm1, %v413_v42, 0.0 }
  0xeb   :  { %716 = vrot.lane.b32.xlu1 %v1417_v44, %s970_s11  ;;  %v461_v12 = vsel %vm452_vm1, %v412_v33, 0.0  ;;  %v462_v17 = vsel %vm452_vm1, %v420_v27, 0.0  ;;  %v465_v20 = vadd.f32 %v455_v56, %v1333_v34 }
  0xec   :  { %v407_v4 = vpop.permute.xlu0 %406  ;;  %v471_v24 = vadd.f32 %v461_v12, %v1417_v44  ;;  %v472_v25 = vadd.f32 %v462_v17, %v1366_v59 }
  0xed   :  { %v411_v16 = vsel %vm410_vm15, %v403_v15, %v407_v4  ;;  %v419_v29 = vsel %vm410_vm15, %v407_v4, %v1474_v51  ;;  %v1603_v32 = vpop.permute.xlu1 %496  ;;  %vm836_vm15 = vcmp.lt.s32.totalorder %v1468_v1, 32 }
  0xee   :  { %714 = vrot.lane.b32.xlu0 %v1423_v21, %s970_s11  ;;  %v456_v26 = vsel %vm452_vm1, %v411_v16, 0.0 }
  0xef   :  { %720 = vrot.lane.b32.xlu1 %v1366_v59, %s970_s11  ;;  %v466_v13 = vadd.f32 %v456_v26, %v1423_v21 }
  0xf0   :  { %v1610_v36 = vpop.permute.xlu0 %494 }
  0xf1   :  { %v501_v43 = vpop.permute.xlu1 %500 }
  0xf2   :  { %718 = vrot.lane.b32.xlu0 %v1391_v30, %s970_s11  ;;  %v522_v37 = vsel %vm514_vm3, %v1603_v32, %v501_v43 }
  0xf3   :  { %v562_v23 = vsel %vm556_vm4, %v522_v37, 0.0  ;;  %743 = vrot.lane.b32.xlu1 %v1306_v19, %s971_s12 }
  0xf4   :  { %v1622_v41 = vadd.f32 %v562_v23, %v489_v11  ;;  %v499_v39 = vpop.permute.xlu0 %498 }
  0xf5   :  { %v521_v46 = vsel %vm514_vm3, %v1610_v36, %v499_v39  ;;  %v1627_v45 = vpop.permute.xlu1 %504 }
  0xf6   :  { %v557_v50 = vsel %vm556_vm4, %v521_v46, 0.0  ;;  %741 = vrot.lane.b32.xlu0 %v1333_v34, %s971_s12  ;;  %v520_v51 = vsel %vm514_vm3, %v501_v43, %v1627_v45 }
  0xf7   :  { %v1638_v52 = vadd.f32 %v557_v50, %v484_v14  ;;  %v563_v0 = vsel %vm556_vm4, %v520_v51, 0.0  ;;  %747 = vrot.lane.b32.xlu1 %v1417_v44, %s971_s12 }
  0xf8   :  { %v573_v53 = vadd.f32 %v563_v0, %v1529_v22  ;;  %v1645_v54 = vpop.permute.xlu0 %502 }
  0xf9   :  { %v519_v57 = vsel %vm514_vm3, %v499_v39, %v1645_v54  ;;  %v432_v61 = vpop.permute.xlu1 %431 }
  0xfa   :  { %v558_v62 = vsel %vm556_vm4, %v519_v57, 0.0  ;;  %745 = vrot.lane.b32.xlu0 %v1423_v21, %s971_s12  ;;  %v447_v19 = vsel %vm441_vm0, %v1502_v58, %v432_v61 }
  0xfb   :  { %v568_v63 = vadd.f32 %v558_v62, %v1544_v5  ;;  %v481_v18 = vsel %vm473_vm2, %v447_v19, 0.0  ;;  %v457_v5 = vsel %vm452_vm1, %v419_v29, 0.0 }
  0xfc   :  { %v491_v22 = vadd.f32 %v481_v18, %v470_v55  ;;  %v430_v8 = vpop.permute.xlu0 %429  ;;  %v467_v38 = vadd.f32 %v457_v5, %v1391_v30 }
  0xfd   :  { %v446_v58 = vsel %vm441_vm0, %v1487_v3, %v430_v8  ;;  %v436_v9 = vpop.permute.xlu1 %435 }
  0xfe   :  { %v476_v34 = vsel %vm473_vm2, %v446_v58, 0.0  ;;  %v443_v44 = vsel %vm441_vm0, %v436_v9, %v1550_v28  ;;  %v445_v59 = vsel %vm441_vm0, %v432_v61, %v436_v9 }
  0xff   :  { %v486_v6 = vadd.f32 %v476_v34, %v465_v20  ;;  %v482_v10 = vsel %vm473_vm2, %v445_v59, 0.0  ;;  %v483_v3 = vsel %vm473_vm2, %v443_v44, 0.0 }
 0x100   :  { %v492_v35 = vadd.f32 %v482_v10, %v471_v24  ;;  %v493_v7 = vadd.f32 %v483_v3, %v472_v25  ;;  %v434_v11 = vpop.permute.xlu0 %433 }
 0x101   :  { %v442_v28 = vsel %vm441_vm0, %v434_v11, %v1566_v49  ;;  %v444_v31 = vsel %vm441_vm0, %v430_v8, %v434_v11  ;;  %v528_v14 = vpop.permute.xlu1 %527 }
 0x102   :  { %v477_v2 = vsel %vm473_vm2, %v444_v31, 0.0  ;;  %v478_v40 = vsel %vm473_vm2, %v442_v28, 0.0 }
 0x103   :  { %v487_v15 = vadd.f32 %v477_v2, %v466_v13  ;;  %v488_v42 = vadd.f32 %v478_v40, %v467_v38 }
 0x104   :  { %v526_v21 = vpop.permute.xlu0 %525 }
 0x105   :  { %v532_v30 = vpop.permute.xlu1 %531 }
 0x106   :  { %v553_v49 = vsel %vm545_vm5, %v528_v14, %v532_v30 }
 0x107   :  { %v584_v48 = vsel %vm577_vm6, %v553_v49, 0.0 }
 0x108   :  { %v594_v33 = vadd.f32 %v584_v48, %v573_v53  ;;  %v530_v27 = vpop.permute.xlu0 %529 }
 0x109   :  { %v552_v4 = vsel %vm545_vm5, %v526_v21, %v530_v27  ;;  %v544_v16 = vpop.permute.xlu1 %543 }
 0x10a   :  { %v579_v29 = vsel %vm577_vm6, %v552_v4, 0.0  ;;  %v555_v43 = vsel %vm545_vm5, %v544_v16, %v528_v14 }
 0x10b   :  { %v589_v37 = vadd.f32 %v579_v29, %v568_v63  ;;  %v583_v23 = vsel %vm577_vm6, %v555_v43, 0.0 }
 0x10c   :  { %v593_v39 = vadd.f32 %v583_v23, %v1622_v41  ;;  %v1714_v46 = vpop.permute.xlu0 %541 }
 0x10d   :  { %v554_v47 = vsel %vm545_vm5, %v1714_v46, %v526_v21  ;;  %v509_v50 = vpop.permute.xlu1 %508 }
 0x10e   :  { %v578_v51 = vsel %vm577_vm6, %v554_v47, 0.0  ;;  %v518_v0 = vsel %vm514_vm3, %v1627_v45, %v509_v50 }
 0x10f   :  { %v588_v53 = vadd.f32 %v578_v51, %v1638_v52  ;;  %v564_v55 = vsel %vm556_vm4, %v518_v0, 0.0 }
 0x110   :  { %v574_v41 = vadd.f32 %v564_v55, %v491_v22  ;;  %v507_v56 = vpop.permute.xlu0 %506 }
 0x111   :  { %v517_v57 = vsel %vm514_vm3, %v1645_v54, %v507_v56  ;;  %v513_v61 = vpop.permute.xlu1 %512 }
 0x112   :  { %v559_v12 = vsel %vm556_vm4, %v517_v57, 0.0  ;;  %v516_v17 = vsel %vm514_vm3, %v509_v50, %v513_v61  ;;  %v524_v45 = vsel %vm514_vm3, %v513_v61, %v1603_v32 }
 0x113   :  { %v569_v52 = vadd.f32 %v559_v12, %v486_v6  ;;  %v565_v62 = vsel %vm556_vm4, %v516_v17, 0.0  ;;  %v566_v19 = vsel %vm556_vm4, %v524_v45, 0.0 }
 0x114   :  { %v575_v63 = vadd.f32 %v565_v62, %v492_v35  ;;  %v576_v54 = vadd.f32 %v566_v19, %v493_v7  ;;  %v511_v18 = vpop.permute.xlu0 %510 }
 0x115   :  { %v515_v20 = vsel %vm514_vm3, %v507_v56, %v511_v18  ;;  %v523_v22 = vsel %vm514_vm3, %v511_v18, %v1610_v36  ;;  %v601_v8 = vpop.permute.xlu1 %600 }
 0x116   :  { %v560_v32 = vsel %vm556_vm4, %v515_v20, 0.0  ;;  %v561_v24 = vsel %vm556_vm4, %v523_v22, 0.0 }
 0x117   :  { %v570_v25 = vadd.f32 %v560_v32, %v487_v15  ;;  %v571_v26 = vadd.f32 %v561_v24, %v488_v42 }
 0x118   :  { %v599_v58 = vpop.permute.xlu0 %598 }
 0x119   :  { %v605_v9 = vpop.permute.xlu1 %604 }
 0x11a   :  { %v626_v5 = vsel %vm618_vm7, %v601_v8, %v605_v9 }
 0x11b   :  { %v666_v36 = vsel %vm660_vm8, %v626_v5, 0.0 }
 0x11c   :  { %v1756_v34 = vadd.f32 %v666_v36, %v593_v39  ;;  %v603_v44 = vpop.permute.xlu0 %602 }
 0x11d   :  { %v625_v59 = vsel %vm618_vm7, %v599_v58, %v603_v44  ;;  %v609_v6 = vpop.permute.xlu1 %608 }
 0x11e   :  { %v661_v10 = vsel %vm660_vm8, %v625_v59, 0.0  ;;  %v624_v3 = vsel %vm618_vm7, %v605_v9, %v609_v6 }
 0x11f   :  { %v1764_v35 = vadd.f32 %v661_v10, %v588_v53  ;;  %v667_v7 = vsel %vm660_vm8, %v624_v3, 0.0 }
 0x120   :  { %v1768_v11 = vadd.f32 %v667_v7, %v594_v33  ;;  %v607_v13 = vpop.permute.xlu0 %606 }
 0x121   :  { %v623_v38 = vsel %vm618_vm7, %v603_v44, %v607_v13  ;;  %v536_v28 = vpop.permute.xlu1 %535 }
 0x122   :  { %v662_v31 = vsel %vm660_vm8, %v623_v38, 0.0  ;;  %v551_v14 = vsel %vm545_vm5, %v532_v30, %v536_v28 }
 0x123   :  { %v1776_v2 = vadd.f32 %v662_v31, %v589_v37  ;;  %v585_v40 = vsel %vm577_vm6, %v551_v14, 0.0 }
 0x124   :  { %v595_v15 = vadd.f32 %v585_v40, %v574_v41  ;;  %v534_v42 = vpop.permute.xlu0 %533 }
 0x125   :  { %v550_v21 = vsel %vm545_vm5, %v530_v27, %v534_v42  ;;  %v540_v49 = vpop.permute.xlu1 %539 }
 0x126   :  { %v580_v48 = vsel %vm577_vm6, %v550_v21, 0.0  ;;  %v547_v33 = vsel %vm545_vm5, %v540_v49, %v544_v16  ;;  %v549_v30 = vsel %vm545_vm5, %v536_v28, %v540_v49 }
 0x127   :  { %v590_v4 = vadd.f32 %v580_v48, %v569_v52  ;;  %v586_v29 = vsel %vm577_vm6, %v549_v30, 0.0  ;;  %v587_v43 = vsel %vm577_vm6, %v547_v33, 0.0 }
 0x128   :  { %v1792_v37 = vadd.f32 %v586_v29, %v575_v63  ;;  %v597_v27 = vadd.f32 %v587_v43, %v576_v54  ;;  %v538_v23 = vpop.permute.xlu0 %537 }
 0x129   :  { %v546_v39 = vsel %vm545_vm5, %v538_v23, %v1714_v46  ;;  %v548_v16 = vsel %vm545_vm5, %v534_v42, %v538_v23  ;;  %v632_v47 = vpop.permute.xlu1 %631 }
 0x12a   :  { %v581_v50 = vsel %vm577_vm6, %v548_v16, 0.0  ;;  %v582_v51 = vsel %vm577_vm6, %v546_v39, 0.0 }
 0x12b   :  { %v1803_v0 = vadd.f32 %v581_v50, %v570_v25  ;;  %v592_v53 = vadd.f32 %v582_v51, %v571_v26 }
 0x12c   :  { %v630_v55 = vpop.permute.xlu0 %629 }
 0x12d   :  { %v1805_v41 = vpop.permute.xlu1 %635 }
 0x12e   :  { %v657_v40 = vsel %vm649_vm9, %v632_v47, %v1805_v41 }
 0x12f   :  { %v688_v30 = vsel %vm681_vm10, %v657_v40, 0.0 }
 0x130   :  { %v1807_v56 = vpop.permute.xlu0 %633  ;;  %v698_v51 = vadd.f32 %v688_v30, %v1768_v11 }
 0x131   :  { %v648_v57 = vpop.permute.xlu1 %647 }
 0x132   :  { %v659_v28 = vsel %vm649_vm9, %v648_v57, %v632_v47 }
 0x133   :  { %v687_v49 = vsel %vm681_vm10, %v659_v28, 0.0 }
 0x134   :  { %v646_v46 = vpop.permute.xlu0 %645  ;;  %v697_v39 = vadd.f32 %v687_v49, %v1756_v34 }
 0x135   :  { %v613_v61 = vpop.permute.xlu1 %612  ;;  %v658_v29 = vsel %vm649_vm9, %v646_v46, %v630_v55 }
 0x136   :  { %v622_v12 = vsel %vm618_vm7, %v609_v6, %v613_v61 }
 0x137   :  { %v668_v17 = vsel %vm660_vm8, %v622_v12, 0.0 }
 0x138   :  { %v1813_v45 = vadd.f32 %v668_v17, %v595_v15  ;;  %v1815_v52 = vpop.permute.xlu0 %610 }
 0x139   :  { %v621_v62 = vsel %vm618_vm7, %v607_v13, %v1815_v52  ;;  %v617_v19 = vpop.permute.xlu1 %616 }
 0x13a   :  { %v663_v63 = vsel %vm660_vm8, %v621_v62, 0.0  ;;  %v628_v54 = vsel %vm618_vm7, %v617_v19, %v601_v8  ;;  %v620_v34 = vsel %vm618_vm7, %v613_v61, %v617_v19 }
 0x13b   :  { %v1824_v18 = vadd.f32 %v663_v63, %v590_v4  ;;  %v670_v20 = vsel %vm660_vm8, %v628_v54, 0.0  ;;  %v656_v4 = vsel %vm649_vm9, %v630_v55, %v1807_v56  ;;  %v682_v55 = vsel %vm681_vm10, %v658_v29, 0.0 }
 0x13c   :  { %v680_v22 = vadd.f32 %v670_v20, %v597_v27  ;;  %v615_v32 = vpop.permute.xlu0 %614  ;;  %v692_v20 = vadd.f32 %v682_v55, %v1764_v35 }
 0x13d   :  { %v627_v24 = vsel %vm618_vm7, %v615_v32, %v599_v58  ;;  %v1830_v25 = vpop.permute.xlu1 %704 }
 0x13e   :  { %v665_v26 = vsel %vm660_vm8, %v627_v24, 0.0 }
 0x13f   :  { %v675_v9 = vadd.f32 %v665_v26, %v592_v53  ;;  %v683_v53 = vsel %vm681_vm10, %v656_v4, 0.0  ;;  %v619_v26 = vsel %vm618_vm7, %v1815_v52, %v615_v32 }
 0x140   :  { %v1834_v5 = vpop.permute.xlu0 %702  ;;  %v693_v19 = vadd.f32 %v683_v53, %v1776_v2 }
 0x141   :  { %v709_v36 = vpop.permute.xlu1 %708 }
 0x142   :  { %v730_v42 = vsel %vm722_vm11, %v1830_v25, %v709_v36 }
 0x143   :  { %v770_v27 = vsel %vm764_vm12, %v730_v42, 0.0 }
 0x144   :  { %v707_v8 = vpop.permute.xlu0 %706 }
 0x145   :  { %v1836_v44 = vpop.permute.xlu1 %712  ;;  %v729_v16 = vsel %vm722_vm11, %v1834_v5, %v707_v8 }
 0x146   :  { %v728_v48 = vsel %vm722_vm11, %v709_v36, %v1836_v44  ;;  %v765_v62 = vsel %vm764_vm12, %v729_v16, 0.0 }
 0x147   :  { %v771_v47 = vsel %vm764_vm12, %v728_v48, 0.0  ;;  %v775_v2 = vadd.f32 %v765_v62, %v692_v20 }
 0x148   :  { %v1838_v59 = vpop.permute.xlu0 %710  ;;  %v781_v63 = vadd.f32 %v771_v47, %v698_v51 }
 0x149   :  { %v640_v6 = vpop.permute.xlu1 %639  ;;  %v727_v50 = vsel %vm722_vm11, %v707_v8, %v1838_v59 }
 0x14a   :  { %v766_v54 = vsel %vm764_vm12, %v727_v50, 0.0  ;;  %v655_v35 = vsel %vm649_vm9, %v1805_v41, %v640_v6 }
 0x14c   :  { %v1840_v10 = vpop.permute.xlu0 %637 }
 0x14d   :  { %v644_v58 = vpop.permute.xlu1 %643  ;;  %v654_v52 = vsel %vm649_vm9, %v1807_v56, %v1840_v10  ;;  %v664_v56 = vsel %vm660_vm8, %v619_v26, 0.0 }
 0x14e   :  { %v651_v3 = vsel %vm649_vm9, %v644_v58, %v648_v57  ;;  %v653_v32 = vsel %vm649_vm9, %v640_v6, %v644_v58  ;;  %v689_v6 = vsel %vm681_vm10, %v655_v35, 0.0 }
 0x14f   :  { %v691_v7 = vsel %vm681_vm10, %v651_v3, 0.0 }
 0x150   :  { %v1849_v13 = vadd.f32 %v691_v7, %v680_v22  ;;  %v642_v38 = vpop.permute.xlu0 %641  ;;  %v669_v22 = vsel %vm660_vm8, %v620_v34, 0.0  ;;  %v776_v7 = vadd.f32 %v766_v54, %v693_v19 }
 0x151   :  { %v650_v31 = vsel %vm649_vm9, %v642_v38, %v646_v46  ;;  %v736_v14 = vpop.permute.xlu1 %735  ;;  %v780_v46 = vadd.f32 %v770_v27, %v697_v39  ;;  %v652_v41 = vsel %vm649_vm9, %v1840_v10, %v642_v38  ;;  %v679_v48 = vadd.f32 %v669_v22, %v1792_v37 }
 0x152   :  { %v686_v15 = vsel %vm681_vm10, %v650_v31, 0.0  ;;  %v690_v10 = vsel %vm681_vm10, %v653_v32, 0.0  ;;  %v674_v27 = vadd.f32 %v664_v56, %v1803_v0 }
 0x153   :  { %v1864_v21 = vadd.f32 %v686_v15, %v675_v9  ;;  %v700_v50 = vadd.f32 %v690_v10, %v679_v48 }
 0x154   :  { %v734_v33 = vpop.permute.xlu0 %733 }
 0x155   :  { %v1879_v43 = vpop.permute.xlu1 %739 }
 0x156   :  { %v761_v23 = vsel %vm753_vm13, %v736_v14, %v1879_v43 }
 0x157   :  { %v792_v12 = vsel %vm785_vm14, %v761_v23, 0.0  ;;  %v699_v23 = vadd.f32 %v689_v6, %v1813_v45 }
 0x158   :  { %v1903_v57 = vpop.permute.xlu0 %737  ;;  %v802_v9 = vadd.f32 %v792_v12, %v781_v63 }
 0x159   :  { %v760_v17 = vsel %vm753_vm13, %v734_v33, %v1903_v57  ;;  %v1910_v11 = vpop.permute.xlu1 %751 }
 0x15a   :  { %v763_v61 = vsel %vm753_vm13, %v1910_v11, %v736_v14  ;;  %v787_v36 = vsel %vm785_vm14, %v760_v17, 0.0  ;;  %v819_v39 = vmul.f32 %v802_v9, %v802_v9 }
 0x15b   :  { %v791_v24 = vsel %vm785_vm14, %v763_v61, 0.0  ;;  %v797_v15 = vadd.f32 %v787_v36, %v776_v7 }
 0x15c   :  { %v801_v8 = vadd.f32 %v791_v24, %v780_v46  ;;  %v1930_v3 = vpop.permute.xlu0 %749  ;;  %v821_v17 = vmul.f32 0.012345679, %v819_v39 }
 0x15d   :  { %v762_v28 = vsel %vm753_vm13, %v1930_v3, %v734_v33  ;;  %v717_v31 = vpop.permute.xlu1 %716  ;;  %v684_v33 = vsel %vm681_vm10, %v654_v52, 0.0  ;;  %v818_v62 = vmul.f32 %v797_v15, %v797_v15 }
 0x15e   :  { %v807_v14 = vmul.f32 %v802_v9, %v801_v8  ;;  %v786_v40 = vsel %vm785_vm14, %v762_v28, 0.0  ;;  %v726_v49 = vsel %vm722_vm11, %v1836_v44, %v717_v31  ;;  %v685_v44 = vsel %vm681_vm10, %v652_v41, 0.0 }
 0x15f   :  { %v796_v42 = vadd.f32 %v786_v40, %v775_v2  ;;  %v772_v4 = vsel %vm764_vm12, %v726_v49, 0.0  ;;  %v694_v47 = vadd.f32 %v684_v33, %v1824_v18  ;;  %v813_v51 = vmul.f32 %v801_v8, %v801_v8 }
 0x160   :  { %v715_v58 = vpop.permute.xlu0 %714  ;;  %v695_v55 = vadd.f32 %v685_v44, %v674_v27  ;;  %v782_v34 = vadd.f32 %v772_v4, %v699_v23  ;;  %v809_v52 = vmul.f32 0.012345679, %v807_v14  ;;  %v820_v33 = vmul.f32 0.012345679, %v818_v62 }
 0x161   :  { %v806_v38 = vmul.f32 %v797_v15, %v796_v42  ;;  %v721_v30 = vpop.permute.xlu1 %720  ;;  %v725_v29 = vsel %vm722_vm11, %v1838_v59, %v715_v58  ;;  %v812_v63 = vmul.f32 %v796_v42, %v796_v42  ;;  %v815_v61 = vmul.f32 0.012345679, %v813_v51 }
 0x162   :  { %v724_v37 = vsel %vm722_vm11, %v717_v31, %v721_v30  ;;  %v732_v16 = vsel %vm722_vm11, %v721_v30, %v1830_v25  ;;  %v767_v59 = vsel %vm764_vm12, %v725_v29, 0.0 }
 0x163   :  { %v773_v0 = vsel %vm764_vm12, %v724_v37, 0.0  ;;  %v774_v45 = vsel %vm764_vm12, %v732_v16, 0.0  ;;  %v777_v19 = vadd.f32 %v767_v59, %v694_v47  ;;  %v814_v35 = vmul.f32 0.012345679, %v812_v63 }
 0x164   :  { %v719_v53 = vpop.permute.xlu0 %718  ;;  %v783_v20 = vadd.f32 %v773_v0, %v700_v50  ;;  %v784_v26 = vadd.f32 %v774_v45, %v1849_v13  ;;  %v808_v10 = vmul.f32 0.012345679, %v806_v38 }
 0x165   :  { %v744_v46 = vpop.permute.xlu1 %743  ;;  %v723_v25 = vsel %vm722_vm11, %v715_v58, %v719_v53  ;;  %v731_v18 = vsel %vm722_vm11, %v719_v53, %v1834_v5 }
 0x166   :  { %v759_v12 = vsel %vm753_vm13, %v1879_v43, %v744_v46  ;;  %v768_v5 = vsel %vm764_vm12, %v723_v25, 0.0  ;;  %v769_v9 = vsel %vm764_vm12, %v731_v18, 0.0 }
 0x167   :  { %v793_v54 = vsel %vm785_vm14, %v759_v12, 0.0  ;;  %v778_v32 = vadd.f32 %v768_v5, %v695_v55  ;;  %v779_v42 = vadd.f32 %v769_v9, %v1864_v21 }
 0x168   :  { %v803_v22 = vadd.f32 %v793_v54, %v782_v34  ;;  %v742_v24 = vpop.permute.xlu0 %741 }
 0x169   :  { %v758_v43 = vsel %vm753_vm13, %v1903_v57, %v742_v24  ;;  %v748_v36 = vpop.permute.xlu1 %747 }
 0x16a   :  { %v817_v8 = vsub.f32 %v803_v22, %v815_v61  ;;  %v788_v2 = vsel %vm785_vm14, %v758_v43, 0.0  ;;  %v755_v7 = vsel %vm753_vm13, %v748_v36, %v1910_v11  ;;  %v757_v13 = vsel %vm753_vm13, %v744_v46, %v748_v36 }
 0x16b   :  { %v798_v28 = vadd.f32 %v788_v2, %v777_v19  ;;  %v794_v31 = vsel %vm785_vm14, %v757_v13, 0.0  ;;  %v795_v57 = vsel %vm785_vm14, %v755_v7, 0.0 }
 0x16c   :  { %v804_v40 = vadd.f32 %v794_v31, %v783_v20  ;;  %v805_v41 = vadd.f32 %v795_v57, %v784_v26  ;;  %v746_v15 = vpop.permute.xlu0 %745 }
 0x16d   :  { %v816_v49 = vsub.f32 %v798_v28, %v814_v35  ;;  %v754_v11 = vsel %vm753_vm13, %v746_v15, %v1930_v3  ;;  %v756_v56 = vsel %vm753_vm13, %v742_v24, %v746_v15 }
 0x16e   :  { %v811_v6 = vsub.f32 %v805_v41, %v809_v52  ;;  %v823_v58 = vsub.f32 %v804_v40, %v821_v17  ;;  %v789_v48 = vsel %vm785_vm14, %v756_v56, 0.0  ;;  %v790_v14 = vsel %vm785_vm14, %v754_v11, 0.0 }
 0x16f   :  { %v799_v30 = vadd.f32 %v789_v48, %v778_v32  ;;  %v800_v21 = vadd.f32 %v790_v14, %v779_v42 }
 0x170   :  { %v827_v44 = vmul.f32 %v823_v58, %v817_v8  ;;  %v825_v23 = vmul.f32 %v811_v6, %v811_v6 }
 0x171   :  { %v810_v4 = vsub.f32 %v800_v21, %v808_v10  ;;  %v822_v29 = vsub.f32 %v799_v30, %v820_v33 }
 0x172   :  { %v829_v37 = vadd.f32 1e-05, %v827_v44 }
 0x173   :  { %v826_v3 = vmul.f32 %v822_v29, %v816_v49  ;;  %v824_v47 = vmul.f32 %v810_v4, %v810_v4 }
 0x174   :  { %884 = vrcp.f32 %v829_v37 }
 0x175   :  { %v828_v27 = vadd.f32 1e-05, %v826_v3 }
 0x177   :  { %886 = vrcp.f32 %v828_v27 }
 0x17e   :  { %v885_v39 = vpop.eup %884 }
 0x17f   :  { %v833_v16 = vmul.f32 %v885_v39, %v825_v23 }
 0x181   :  { %v887_v60 = vpop.eup %886  ;;  %v840_v51 = vsel %vm836_vm15, %v833_v16, 0.0 }
 0x182   :  { %v831_v50 = vmul.f32 %v887_v60, %v824_v47 }
 0x184   :  { %v839_v38 = vsel %vm836_vm15, %v831_v50, 0.0 }
 0x185   :  { %v841_v53 = vadd.f32 %v840_v51, %v839_v38 }
 0x187   :  { %842 = vadd.xlane.f32.xlu0 %v841_v53 }
 0x214   :  { %v843_v55 = vpop.xlane.xlu0 %842 }
 0x215   :  { %v844_v34 = vrot.slane %v843_v55, 4 }
 0x217   :  { %v845_v59 = vadd.f32 %v844_v34, %v843_v55 }
 0x219   :  { %v846_v0 = vrot.slane %v845_v59, 2 }
 0x21b   :  { %v847_v46 = vadd.f32 %v846_v0, %v845_v59 }
 0x21d   :  { %v848_v45 = vrot.slane %v847_v46, 1 }
 0x21f   :  { %v849_v25 = vadd.f32 %v848_v45, %v847_v46 }
 0x221   :  { %869 = vpush %v849_v25 }
 0x252   :  { %s870_s15 = spop %869 }
 0x253   :  { %v851_v1 = vstv %s870_s15 }
 0x254   :  { %852 = vst [vmem:[#allocation7] sm:$0xff] %v851_v1 }
 0x255   :  { %943 = shalt.err (!%p940_p6)
}
 0x256   :  { %s944_s19 = scalar_lea.hbm %s2036_s2, 128 }
 0x257   :  { %p945_p7 = scmp.ne.s32.totalorder %s2036_s2, %s944_s19  ;;  %p948_p8 = scmp.lt.u32.totalorder %s944_s19, %s2036_s2 }
 0x259   :  { %p950_p9 = pnand %p948_p8, %p945_p7 }
 0x25b   :  { %953 = shalt.err (!%p950_p9)
}
 0x25c   :  { %862 = dma.vmem_to_hbm [thread:$0]  %s860_s14, 128, %s2036_s2, [#allocation4]  }
 0x25d   :  { %958 = dma.done.wait [#allocation4], 128  }
 0x25e   :  { %959 = vsyncadd [#allocation4], 4294967168 }
 0x25f   :  { %866 = vsyncpa [#allocation3], 1 }
 0x260   :  { %867 = vsyncpa [#allocation6], 1 }
 0x261   :  { %868 = vsyncpa [#allocation4], 1 }

</bundles_post_ra>
